<compile_context>
chip_gen: v5e
topology: v5e:2x2
jax: 0.10.0
libtpu: 0.0.40
codegen_flags: <defaults>
</compile_context>

<pallas_src>
import jax
import jax.numpy as jnp
from jax.experimental import pallas as pl
from jax.experimental.pallas import tpu as pltpu


def _mm_self_kernel(a_ref, b_ref, o_ref):
    """One (tm, tn) output tile of S @ S, accumulated directly into o_ref."""

    @pl.when(pl.program_id(2) == 0)
    def _init():
        o_ref[...] = jnp.zeros_like(o_ref)

    o_ref[...] += jnp.dot(
        a_ref[...], b_ref[...], preferred_element_type=jnp.float32
    )


def _mm_self_kernel_bf16(a_ref, b_ref, o_ref):
    """Same, but feeds the MXU bf16 tiles (f32 accumulation). Numerics differ
    slightly from torch fp32 mm; opt-in only."""

    @pl.when(pl.program_id(2) == 0)
    def _init():
        o_ref[...] = jnp.zeros_like(o_ref)

    o_ref[...] += jnp.dot(
        a_ref[...].astype(jnp.bfloat16),
        b_ref[...].astype(jnp.bfloat16),
        preferred_element_type=jnp.float32,
    )


def _round_up(x, m):
    return (x + m - 1) // m * m


def _pick_tile(n_pad, preferred):
    for t in preferred:
        if t <= n_pad and n_pad % t == 0:
            return t
    return n_pad


def model_forward(
    x1,
    x2,
    inp=None,
    *,
    tile_m=None,
    tile_n=None,
    tile_k=None,
    use_bf16_tiles=False,
    min_pallas_dim=256,
):
    """Reproduces Model.forward(x1, x2, inp) -> mm(x1 + x2, x1 + x2).

    `inp` is unused by the original module. `v1 = mm(x1, x1)` is dead code in
    the original forward and is therefore not computed.
    """
    assert x1.shape == x2.shape and x1.ndim == 2
    m, k = x1.shape
    assert m == k, "mm(S, S) requires a square S"
    n = m

    # Small-shape fast path: the module's real shapes (3x3) -- padding to
    # 128x128 + grid launch + slice is pure overhead; let XLA handle it.
    if n < min_pallas_dim and tile_m is None and tile_n is None and tile_k is None:
        s = (x1 + x2).astype(jnp.float32)
        return jnp.dot(s, s, preferred_element_type=jnp.float32)

    # Compute S once (single fused XLA add+pad pass); only 2 input streams
    # enter the kernel.  Zero padding is exact for S @ S.
    s = (x1 + x2).astype(jnp.float32)
    n_pad = max(_round_up(n, 128), 128)
    if n_pad != n:
        s = jnp.pad(s, ((0, n_pad - n), (0, n_pad - n)))

    # Tile sizes: large output tiles to minimize re-stream traffic
    # (~N^3/tm + N^3/tn HBM reads) and amortize per-grid-step overhead.
    tm = tile_m or _pick_tile(n_pad, (512, 256, 128))
    tn = tile_n or _pick_tile(n_pad, (512, 256, 128))
    tk = tile_k or _pick_tile(n_pad, (512, 256, 128))

    # Keep >= 2 parallel grid cells when possible so v7x's 2 TensorCores
    # (sharded over the "parallel" axes) both get work.  v5e/v6e: no harm.
    if tile_m is None:
        while (n_pad // tm) * (n_pad // tn) < 2 and tm > 128:
            tm //= 2

    assert n_pad % tm == 0, f"tile_m={tm} must divide padded dim {n_pad}"
    assert n_pad % tn == 0, f"tile_n={tn} must divide padded dim {n_pad}"
    assert n_pad % tk == 0, f"tile_k={tk} must divide padded dim {n_pad}"

    grid = (n_pad // tm, n_pad // tn, n_pad // tk)

    kernel = _mm_self_kernel_bf16 if use_bf16_tiles else _mm_self_kernel

    # Footprint: double-buffered A (tm*tk) + B (tk*tn) f32 tiles + resident
    # output tile (tm*tn) f32 -- a few MiB at 512 tiles, far under VMEM.
    flops = 2 * n_pad * n_pad * n_pad
    bytes_accessed = 4 * n_pad * n_pad * ((n_pad // tn) + (n_pad // tm) + 1)

    out = pl.pallas_call(
        kernel,
        out_shape=jax.ShapeDtypeStruct((n_pad, n_pad), jnp.float32),
        grid=grid,
        in_specs=[
            pl.BlockSpec((tm, tk), lambda i, j, kk: (i, kk)),   # S -> A tile
            pl.BlockSpec((tk, tn), lambda i, j, kk: (kk, j)),   # S -> B tile
        ],
        out_specs=pl.BlockSpec((tm, tn), lambda i, j, kk: (i, j)),
        compiler_params=pltpu.CompilerParams(
            dimension_semantics=("parallel", "parallel", "arbitrary"),
            vmem_limit_bytes=32 * 1024 * 1024,
        ),
        cost_estimate=pl.CostEstimate(
            flops=flops, transcendentals=0, bytes_accessed=bytes_accessed
        ),
    )(s, s)

    if n_pad != n:
        out = out[:n, :n]
    return out


if __name__ == "__main__":
    key = jax.random.PRNGKey(0)
    k1, k2, k3 = jax.random.split(key, 3)

    # Small demo shape consistent with the module (original used 3x3); this
    # hits the no-Pallas fast path by design.
    N = 32
    x1 = jax.random.normal(k1, (N, N), dtype=jnp.float32)
    x2 = jax.random.normal(k2, (N, N), dtype=jnp.float32)
    inp = jax.random.normal(k3, (N, N), dtype=jnp.float32)  # unused, mirrors signature

    out = jax.block_until_ready(model_forward(x1, x2, inp))
    s = x1 + x2
    ref = s @ s
    assert out.shape == ref.shape
    assert jnp.allclose(out, ref, atol=1e-4, rtol=1e-4), "mismatch vs reference (small)"

    # Exercise the Pallas path (multi-tile grid, k-accumulation into o_ref).
    M = 512
    y1 = jax.random.normal(k1, (M, M), dtype=jnp.float32)
    y2 = jax.random.normal(k2, (M, M), dtype=jnp.float32)
    out2 = jax.block_until_ready(model_forward(y1, y2, tile_m=256, tile_n=256, tile_k=256))
    ref2 = (y1 + y2) @ (y1 + y2)
    rel_err = jnp.linalg.norm(out2 - ref2) / (jnp.linalg.norm(ref2) + 1e-6)
    assert rel_err < 1e-3, f"mismatch vs reference (tiled), rel_err={rel_err}"

    # Also run with automatic tile selection (larger tiles, v7x-friendly grid).
    out3 = jax.block_until_ready(model_forward(y1, y2))
    rel_err3 = jnp.linalg.norm(out3 - ref2) / (jnp.linalg.norm(ref2) + 1e-6)
    assert rel_err3 < 1e-3, f"mismatch vs reference (auto tiles), rel_err={rel_err3}"

    print("KERNEL_OK")
</pallas_src>

<mosaic_0001>
module attributes {stable_mosaic.version = 11 : i64} {
  func.func @_mm_self_kernel(%arg0: i32, %arg1: i32, %arg2: i32, %arg3: memref<256x256xf32, #tpu.memory_space<vmem>>, %arg4: memref<256x256xf32, #tpu.memory_space<vmem>>, %arg5: memref<256x256xf32, #tpu.memory_space<vmem>>) attributes {dimension_semantics = [#tpu.dimension_semantics<parallel>, #tpu.dimension_semantics<parallel>, #tpu.dimension_semantics<arbitrary>], iteration_bounds = array<i64: 2, 2, 2>, scalar_prefetch = 0 : i64, scratch_operands = 0 : i64, tpu.core_type = #tpu.core_type<tc>, window_params = [{transform_indices = @transform_0, window_bounds = array<i64: 256, 256>}, {transform_indices = @transform_1, window_bounds = array<i64: 256, 256>}, {transform_indices = @transform_2, window_bounds = array<i64: 256, 256>}]} {
    %c0_i32 = arith.constant 0 : i32
    %0 = arith.cmpi eq, %arg2, %c0_i32 : i32
    %1 = arith.extui %0 : i1 to i32
    %c0_i32_0 = arith.constant 0 : i32
    %2 = arith.cmpi ne, %1, %c0_i32_0 : i32
    scf.if %2 {
      %cst_8 = arith.constant 0.000000e+00 : f32
      %9 = vector.broadcast %cst_8 : f32 to vector<256x256xf32>
      %c0_9 = arith.constant 0 : index
      %c0_10 = arith.constant 0 : index
      %10 = vector.load %arg5[%c0_9, %c0_10] : memref<256x256xf32, #tpu.memory_space<vmem>>, vector<256x256xf32>
      tpu.vector_store %arg5[%c0_9, %c0_10], %9 {strides = array<i32>} : memref<256x256xf32, #tpu.memory_space<vmem>>, vector<256x256xf32>,
    } else {
    }
    %c0 = arith.constant 0 : index
    %c0_1 = arith.constant 0 : index
    %3 = vector.load %arg5[%c0, %c0_1] : memref<256x256xf32, #tpu.memory_space<vmem>>, vector<256x256xf32>
    %c0_2 = arith.constant 0 : index
    %c0_3 = arith.constant 0 : index
    %4 = vector.load %arg3[%c0_2, %c0_3] : memref<256x256xf32, #tpu.memory_space<vmem>>, vector<256x256xf32>
    %c0_4 = arith.constant 0 : index
    %c0_5 = arith.constant 0 : index
    %5 = vector.load %arg4[%c0_4, %c0_5] : memref<256x256xf32, #tpu.memory_space<vmem>>, vector<256x256xf32>
    %cst = arith.constant dense<0.000000e+00> : vector<256x256xf32>
    %6 = tpu.matmul %4, %5, %cst {dimension_numbers = #tpu.dot_dimension_numbers<[1], [0], [0], [1], [0, 0, 1, 1], [], []>} : vector<256x256xf32>, vector<256x256xf32>, vector<256x256xf32> -> vector<256x256xf32>
    %7 = arith.addf %3, %6 : vector<256x256xf32>
    %c0_6 = arith.constant 0 : index
    %c0_7 = arith.constant 0 : index
    %8 = vector.load %arg5[%c0_6, %c0_7] : memref<256x256xf32, #tpu.memory_space<vmem>>, vector<256x256xf32>
    tpu.vector_store %arg5[%c0_6, %c0_7], %7 {strides = array<i32>} : memref<256x256xf32, #tpu.memory_space<vmem>>, vector<256x256xf32>,
    return
  }
  func.func @transform_0(%arg0: i32, %arg1: i32, %arg2: i32) -> (i32, i32) {
    %c0_i32 = arith.constant 0 : i32
    return %arg0, %arg2 : i32, i32
  }
  func.func @transform_1(%arg0: i32, %arg1: i32, %arg2: i32) -> (i32, i32) {
    %c0_i32 = arith.constant 0 : i32
    return %arg2, %arg1 : i32, i32
  }
  func.func @transform_2(%arg0: i32, %arg1: i32, %arg2: i32) -> (i32, i32) {
    %c0_i32 = arith.constant 0 : i32
    return %arg0, %arg1 : i32, i32
  }
}

</mosaic_0001>

<bundles_post_ra>
// kernel: tpu_custom_call.1
= control target key start
LH: loop header
LB: loop body
LE: loop exit
PB: predicated region body
PF: predicated region fallthrough
CT: control target
= control target key end

     0   :  { %s2346_s0 = inlined_call_operand.hbm [shape: f32[512,512], index: 0, kind: input, shape index: {}]   ;;  %s2347_s1 = inlined_call_operand.hbm [shape: f32[512,512], index: 1, kind: input, shape index: {}]   ;;  %s2348_s2 = inlined_call_operand.hbm [shape: f32[512,512], index: 2, kind: output, shape index: {}]  }
   0x1   :  { %2361 = sst [smem:[#allocation22_spill]] %s2346_s0 }
   0x2   :  { %2362 = sst [smem:[#allocation23_spill]] %s2348_s2 }
   0x3   :  { %7 = vsyncpa [#allocation3], 0 }
   0x4   :  { %9 = vsyncpa [#allocation3 + $0x1], 0 }
   0x5   :  { %10 = vsyncpa [#allocation6], 0 }
   0x6   :  { %12 = vsyncpa [#allocation6 + $0x1], 0 }
   0x7   :  { %13 = vsyncpa [#allocation4], 0 }
   0x8   :  { %15 = vsyncpa [#allocation4 + $0x1], 0  ;;  %s1657_s9 = smov 0   ;;  %s1659_s10 = smov 0  }
   0x9   :  { %s1661_s11 = smov 0   ;;  %s1663_s12 = smov 0  }
   0xa   :  { %s1665_s13 = smov 0   ;;  %s1667_s14 = smov 0  }
   0xb   :  { %s1669_s15 = smov 0   ;;  %s1671_s16 = smov 0  }
   0xc   :  { %s1673_s17 = smov 0   ;;  %s1675_s18 = smov 0  }
   0xd   :  { %s1677_s19 = smov 0   ;;  %s1679_s20 = smov 0  }
   0xe   :  { %s1681_s21 = smov 0   ;;  %s1683_s22 = smov 0  }
   0xf   :  { %s1685_s23 = smov 0   ;;  %s1687_s24 = smov 0  }
  0x10 LB: > { %2363 = sst [smem:[#allocation11_spill]] %s1593_s14  ;;  %s33_s25 = sadd.s32 1, %s1621_s21  ;;  %s1633_s24 = sphi %s1687_s24, %s21_s24   ;;  %s1629_s23 = sphi %s1685_s23, %s2402_s23   ;;  %s1625_s22 = sphi %s1683_s22, %s2413_s22   ;;  %s1621_s21 = sphi %s1681_s21, %s2412_s21   ;;  %s1617_s20 = sphi %s1679_s20, %s2399_s20   ;;  %s1613_s19 = sphi %s1677_s19, %s2411_s19   ;;  %s1609_s18 = sphi %s1675_s18, %s2410_s18   ;;  %s1605_s17 = sphi %s1673_s17, %s2398_s17   ;;  %s1601_s16 = sphi %s1671_s16, %s2409_s16   ;;  %s1597_s15 = sphi %s1669_s15, %s2408_s15   ;;  %s1593_s14 = sphi %s1667_s14, %s2396_s14   ;;  %s1589_s13 = sphi %s1665_s13, %s2407_s13   ;;  %s1585_s12 = sphi %s1663_s12, %s2406_s12   ;;  %s1581_s11 = sphi %s1661_s11, %s2405_s11   ;;  %s1577_s10 = sphi %s1659_s10, %s2404_s10   ;;  %s1573_s9 = sphi %s1657_s9, %s2403_s9  }
  0x11   : > { %2364 = sst [smem:[#allocation12_spill]] %s1605_s17  ;;  %s2349_s26 = sadd.s32 4294967295, %s1633_s24  }
  0x12   : > { %2365 = sst [smem:[#allocation13_spill]] %s1613_s19  ;;  %p1737_p0 = scmp.ge.s32.totalorder %s33_s25, 2 }
  0x13   : > { %2366 = sst [smem:[#allocation14_spill]] %s1617_s20  ;;  %p56_p1 = scmp.ne.s32.totalorder %s1605_s17, %s1601_s16 }
  0x14   : > { %2367 = sst [smem:[#allocation15_spill]] %s1629_s23  ;;  %s2415_s25 = smov (%p1737_p0, %s33_s25), 0 }
  0x15   : > { %2369 = sst [smem:[#allocation16_spill]] %s2415_s25  ;;  %p57_p2 = scmp.eq.s32.totalorder %s1633_s24, 0 }
  0x16   : > { %p62_p3 = scmp.ne.s32.totalorder %s1601_s16, %s1597_s15  ;;  %p1753_p4 = scmp.eq.s32.totalorder %s2349_s26, 0 }
  0x17   : > { %s1759_s3 = ssub.s32 %s1621_s21, %s2415_s25  ;;  %p58_p5 = por %p57_p2, %p56_p1 }
  0x18   : > { %p1765_p6 = por %p1753_p4, %p62_p3  ;;  %p2355_p7 = scmp.lt.s32.totalorder %s1633_s24, 8 }
  0x19   : > { %s142_s5 = sand.u32 1, %s1605_s17   ;;  %s1230_s7 = sshll.u32 %s1621_s21, 1 }
  0x1a   : > { %s1228_s6 = sshll.u32 %s142_s5, 9  ;;  %s1250_s8 = sshll.u32 %s1629_s23, 7 }
  0x1b   : > { %s146_s15 = scalar_lea.vmem [#allocation2], %s1228_s6  ;;  %s152_s28 = sadd.s32 %s1250_s8, %s1230_s7 }
  0x1c   : > { %s157_s29 = sshll.u32 %s146_s15, 4  ;;  %s1232_s26 = sshll.u32 %s152_s28, 3  ;;  %s158_s29 = int_to_ptr.vmem [resolvable:$true] %s157_s29 }
  0x1d   : > { %p1260_p8 = pnand %p2355_p7, %p58_p5  ;;  %s2372_s0 = sld [smem:[#allocation22_spill]] }
  0x1e   : > { %p1238_p9 = scmp.ge.s32.totalorder %s1633_s24, 1  ;;  %s143_s6 = scalar_lea.sflag [#allocation3], %s142_s5 }
  0x1f   : > { %s2352_s7 = smov 512   ;;  %s2353_s28 = smov 256  }
  0x20   : > { %s2354_s8 = smov 16   ;;  %s2373_s2 = sadd.s32 4294967295, %s1633_s24  }
  0x21   : > { %p1784_p10 = scmp.eq.s32.totalorder %s2373_s2, 7  ;;  %p190_p11 = scmp.lt.s32.totalorder %s1633_s24, 9 }
  0x22   : > { %s1225_s5 = sadd.s32 4294967294, %s1633_s24   ;;  %p90_p1 = scmp.ne.s32.totalorder %s1589_s13, %s1585_s12 }
  0x23   : > { %s154_s20 = scalar_lea.hbm %s2372_s0, %s1232_s26  ;;  %p1789_p12 = pnand %p1238_p9, %p190_p11 }
  0x24   : > { %s155_s19 = sshll.u32 %s154_s20, 4  ;;  %s36_s26 = sadd.s32 1, %s1625_s22  ;;  %s156_s19 = int_to_ptr.hbm [resolvable:$true] %s155_s19 }
  0x25   : > { %1262 = dma.hbm_to_vmem [thread:$0]  (!%p1260_p8), %s156_s19, 8192, %s158_s29, %s143_s6, %s2352_s7, %s2353_s28, %s2354_s8  }
  0x26   : > { %s2417_s26 = smov (!%p1737_p0, %s36_s26), %s1625_s22  ;;  %s77_s19 = sadd.s32 1, %s1593_s14 }
  0x27   : > { %p38_p13 = scmp.ge.s32.totalorder %s2417_s26, 2  ;;  %p84_p3 = scmp.ne.s32.totalorder %s1593_s14, %s1589_s13 }
  0x28   : > { %s105_s29 = sadd.s32 1, %s1581_s11  ;;  %s2377_s15 = sadd.s32 1, %s1629_s23 }
  0x29   : > { %s2419_s26 = smov (%p38_p13, %s2417_s26), 0  ;;  %s2421_s15 = smov (!%p38_p13, %s2377_s15), %s1629_s23 }
  0x2a   : > { %2376 = sst [smem:[#allocation17_spill]] %s2419_s26  ;;  %s73_s6 = ssub.s32 %s1625_s22, %s2419_s26 }
  0x2b   : > { %p1813_p0 = por %p90_p1, %p1753_p4  ;;  %p42_p5 = scmp.ge.s32.totalorder %s2421_s15, 2 }
  0x2c   : > { %s74_s12 = sor.u32 %s73_s6, %s1759_s3  ;;  %p115_p9 = scmp.ne.s32.totalorder %s1581_s11, %s1577_s10 }
  0x2d   : > { %p75_p8 = scmp.eq.s32.totalorder %s74_s12, 0  ;;  %s2423_s15 = smov (%p42_p5, %s2421_s15), 0 }
  0x2e   : > { %2379 = sst [smem:[#allocation18_spill]] %s2423_s15  ;;  %s44_s2 = ssub.s32 %s1629_s23, %s2423_s15 }
  0x2f   : > { %s1823_s30 = scalar_select %p75_p8, %s1593_s14, %s77_s19  }
  0x30   : > { %p1829_p4 = por %p1784_p10, %p115_p9  ;;  %s46_s28 = sor.u32 %s1759_s3, %s44_s2 }
  0x31   : > { %2380 = sst [smem:[#allocation19_spill]] %s1823_s30  ;;  %s102_s8 = sor.u32 %s73_s6, %s44_s2 }
  0x32   : > { %p47_p11 = scmp.eq.s32.totalorder %s46_s28, 0  ;;  %p103_p13 = scmp.eq.s32.totalorder %s102_s8, 0 }
  0x33   : > { %p121_p1 = scmp.ne.s32.totalorder %s1577_s10, %s1573_s9  ;;  %p122_p7 = scmp.eq.s32.totalorder %s1225_s5, 7 }
  0x34   : > { %s2382_s12 = sadd.s32 1, %s1605_s17  ;;  %s167_s20 = sand.u32 1, %s1593_s14  }
  0x35   : > { %s1839_s0 = scalar_select %p47_p11, %s1605_s17, %s2382_s12  }
  0x36   : > { %s1842_s26 = scalar_select %p103_p13, %s1581_s11, %s105_s29  }
  0x37   : > { %2383 = sst [smem:[#allocation20_spill]] %s1839_s0  ;;  %p1844_p5 = por %p122_p7, %p121_p1 }
  0x38   : > { %2384 = sst [smem:[#allocation21_spill]] %s1842_s26  ;;  %p86_p10 = por %p84_p3, %p57_p2 }
  0x39   : > { %s1233_s3 = sshll.u32 %s167_s20, 9  ;;  %s1235_s6 = sshll.u32 %s1625_s22, 1 }
  0x3a   : > { %s1251_s28 = sshll.u32 %s1621_s21, 7  ;;  %s171_s2 = scalar_lea.vmem [#allocation5], %s1233_s3 }
  0x3b   : > { %s182_s8 = sshll.u32 %s171_s2, 4  ;;  %s177_s15 = sadd.s32 %s1251_s28, %s1235_s6  ;;  %s183_s8 = int_to_ptr.vmem [resolvable:$true] %s182_s8 }
  0x3c   : > { %s1237_s5 = sshll.u32 %s177_s15, 3  ;;  %p2386_p8 = scmp.lt.s32.totalorder %s1633_s24, 8 }
  0x3d   : > { %s179_s23 = scalar_lea.hbm %s2347_s1, %s1237_s5  ;;  %s168_s17 = scalar_lea.sflag [#allocation6], %s167_s20 }
  0x3e   : > { %p1263_p9 = pnand %p2386_p8, %p86_p10  ;;  %s180_s0 = sshll.u32 %s179_s23, 4  ;;  %s181_s0 = int_to_ptr.hbm [resolvable:$true] %s180_s0 }
  0x3f   : > { %s2387_s30 = smov 16   ;;  %s2388_s14 = smov 256  }
  0x40   : > { %s2389_s26 = smov 512   ;;  %194 = sbr.rel (%p1789_p12) target bundleno = 568 (0x238), region = 28 }
  0x41   : > { %1265 = dma.hbm_to_vmem [thread:$0]  (!%p1263_p9), %s181_s0, 8192, %s183_s8, %s168_s17, %s2389_s26, %s2388_s14, %s2387_s30  }
  0x42   : > { %s196_s15 = sand.u32 (!%p1789_p12), 1, %s1601_s16  }
  0x43   : > { %s1239_s3 = sshll.u32 (!%p1789_p12), %s196_s15, 9  ;;  %s197_s6 = scalar_lea.sflag (!%p1789_p12), [#allocation3], %s196_s15 }
  0x44   : > { %s1867_s28 = scalar_lea.vmem (!%p1789_p12), [#allocation2], %s1239_s3 }
  0x45   : > { %1560 = dma.done.wait (%p1765_p6), %s197_s6, 8192  }
  0x46   : > { %1562 = vsyncadd (%p1765_p6), %s197_s6, 4294959104  ;;  %s206_s23 = sand.u32 1, %s1589_s13  }
  0x47   : > { %s1240_s20 = sshll.u32 %s206_s23, 9  ;;  %s207_s0 = scalar_lea.sflag [#allocation6], %s206_s23 }
  0x48   : > { %s1874_s14 = scalar_lea.vmem [#allocation5], %s1240_s20 }
  0x49   : > { %1564 = dma.done.wait (%p1813_p0), %s207_s0, 8192  }
  0x4a   : > { %1566 = vsyncadd (%p1813_p0), %s207_s0, 4294959104  ;;  %s234_s17 = sand.u32 1, %s1577_s10   ;;  %p1242_p2 = scmp.ne.s32.totalorder %s1609_s18, 0 }
  0x4b   : > { %s1241_s25 = sshll.u32 %s234_s17, 9 }
  0x4c   : > { %s1883_s26 = scalar_lea.vmem [#allocation7], %s1241_s25  ;;  %246 = sbr.rel (%p1242_p2) target bundleno = 146 (0x92), region = 40 }
  0x51   : > { %v1638_v0 = vmov 0.0  }
  0x52   : > { %247 = vst [vmem:[%s1883_s26] sm:$0xff] %v1638_v0 }
  0x53   : > { %248 = vst [vmem:[%s1883_s26 + $0x8] sm:$0xff] %v1638_v0 }
  0x54   : > { %249 = vst [vmem:[%s1883_s26 + $0x10] sm:$0xff] %v1638_v0 }
  0x55   : > { %250 = vst [vmem:[%s1883_s26 + $0x18] sm:$0xff] %v1638_v0 }
  0x56   : > { %251 = vst [vmem:[%s1883_s26 + $0x20] sm:$0xff] %v1638_v0 }
  0x57   : > { %252 = vst [vmem:[%s1883_s26 + $0x28] sm:$0xff] %v1638_v0 }
  0x58   : > { %253 = vst [vmem:[%s1883_s26 + $0x30] sm:$0xff] %v1638_v0 }
  0x59   : > { %254 = vst [vmem:[%s1883_s26 + $0x38] sm:$0xff] %v1638_v0 }
  0x5a   : > { %255 = vst [vmem:[%s1883_s26 + $0x40] sm:$0xff] %v1638_v0 }
  0x5b   : > { %256 = vst [vmem:[%s1883_s26 + $0x48] sm:$0xff] %v1638_v0 }
  0x5c   : > { %257 = vst [vmem:[%s1883_s26 + $0x50] sm:$0xff] %v1638_v0 }
  0x5d   : > { %258 = vst [vmem:[%s1883_s26 + $0x58] sm:$0xff] %v1638_v0 }
  0x5e   : > { %259 = vst [vmem:[%s1883_s26 + $0x60] sm:$0xff] %v1638_v0 }
  0x5f   : > { %260 = vst [vmem:[%s1883_s26 + $0x68] sm:$0xff] %v1638_v0 }
  0x60   : > { %261 = vst [vmem:[%s1883_s26 + $0x70] sm:$0xff] %v1638_v0 }
  0x61   : > { %262 = vst [vmem:[%s1883_s26 + $0x78] sm:$0xff] %v1638_v0 }
  0x62   : > { %263 = vst [vmem:[%s1883_s26 + $0x80] sm:$0xff] %v1638_v0 }
  0x63   : > { %264 = vst [vmem:[%s1883_s26 + $0x88] sm:$0xff] %v1638_v0 }
  0x64   : > { %265 = vst [vmem:[%s1883_s26 + $0x90] sm:$0xff] %v1638_v0 }
  0x65   : > { %266 = vst [vmem:[%s1883_s26 + $0x98] sm:$0xff] %v1638_v0 }
  0x66   : > { %267 = vst [vmem:[%s1883_s26 + $0xa0] sm:$0xff] %v1638_v0 }
  0x67   : > { %268 = vst [vmem:[%s1883_s26 + $0xa8] sm:$0xff] %v1638_v0 }
  0x68   : > { %269 = vst [vmem:[%s1883_s26 + $0xb0] sm:$0xff] %v1638_v0 }
  0x69   : > { %270 = vst [vmem:[%s1883_s26 + $0xb8] sm:$0xff] %v1638_v0 }
  0x6a   : > { %271 = vst [vmem:[%s1883_s26 + $0xc0] sm:$0xff] %v1638_v0 }
  0x6b   : > { %272 = vst [vmem:[%s1883_s26 + $0xc8] sm:$0xff] %v1638_v0 }
  0x6c   : > { %273 = vst [vmem:[%s1883_s26 + $0xd0] sm:$0xff] %v1638_v0 }
  0x6d   : > { %274 = vst [vmem:[%s1883_s26 + $0xd8] sm:$0xff] %v1638_v0 }
  0x6e   : > { %275 = vst [vmem:[%s1883_s26 + $0xe0] sm:$0xff] %v1638_v0 }
  0x6f   : > { %276 = vst [vmem:[%s1883_s26 + $0xe8] sm:$0xff] %v1638_v0 }
  0x70   : > { %277 = vst [vmem:[%s1883_s26 + $0xf0] sm:$0xff] %v1638_v0 }
  0x71   : > { %278 = vst [vmem:[%s1883_s26 + $0xf8] sm:$0xff] %v1638_v0 }
  0x72   : > { %279 = vst [vmem:[%s1883_s26 + $0x100] sm:$0xff] %v1638_v0 }
  0x73   : > { %280 = vst [vmem:[%s1883_s26 + $0x108] sm:$0xff] %v1638_v0 }
  0x74   : > { %281 = vst [vmem:[%s1883_s26 + $0x110] sm:$0xff] %v1638_v0 }
  0x75   : > { %282 = vst [vmem:[%s1883_s26 + $0x118] sm:$0xff] %v1638_v0 }
  0x76   : > { %283 = vst [vmem:[%s1883_s26 + $0x120] sm:$0xff] %v1638_v0 }
  0x77   : > { %284 = vst [vmem:[%s1883_s26 + $0x128] sm:$0xff] %v1638_v0 }
  0x78   : > { %285 = vst [vmem:[%s1883_s26 + $0x130] sm:$0xff] %v1638_v0 }
  0x79   : > { %286 = vst [vmem:[%s1883_s26 + $0x138] sm:$0xff] %v1638_v0 }
  0x7a   : > { %287 = vst [vmem:[%s1883_s26 + $0x140] sm:$0xff] %v1638_v0 }
  0x7b   : > { %288 = vst [vmem:[%s1883_s26 + $0x148] sm:$0xff] %v1638_v0 }
  0x7c   : > { %289 = vst [vmem:[%s1883_s26 + $0x150] sm:$0xff] %v1638_v0 }
  0x7d   : > { %290 = vst [vmem:[%s1883_s26 + $0x158] sm:$0xff] %v1638_v0 }
  0x7e   : > { %291 = vst [vmem:[%s1883_s26 + $0x160] sm:$0xff] %v1638_v0 }
  0x7f   : > { %292 = vst [vmem:[%s1883_s26 + $0x168] sm:$0xff] %v1638_v0 }
  0x80   : > { %293 = vst [vmem:[%s1883_s26 + $0x170] sm:$0xff] %v1638_v0 }
  0x81   : > { %294 = vst [vmem:[%s1883_s26 + $0x178] sm:$0xff] %v1638_v0 }
  0x82   : > { %295 = vst [vmem:[%s1883_s26 + $0x180] sm:$0xff] %v1638_v0 }
  0x83   : > { %296 = vst [vmem:[%s1883_s26 + $0x188] sm:$0xff] %v1638_v0 }
  0x84   : > { %297 = vst [vmem:[%s1883_s26 + $0x190] sm:$0xff] %v1638_v0 }
  0x85   : > { %298 = vst [vmem:[%s1883_s26 + $0x198] sm:$0xff] %v1638_v0 }
  0x86   : > { %299 = vst [vmem:[%s1883_s26 + $0x1a0] sm:$0xff] %v1638_v0 }
  0x87   : > { %300 = vst [vmem:[%s1883_s26 + $0x1a8] sm:$0xff] %v1638_v0 }
  0x88   : > { %301 = vst [vmem:[%s1883_s26 + $0x1b0] sm:$0xff] %v1638_v0 }
  0x89   : > { %302 = vst [vmem:[%s1883_s26 + $0x1b8] sm:$0xff] %v1638_v0 }
  0x8a   : > { %303 = vst [vmem:[%s1883_s26 + $0x1c0] sm:$0xff] %v1638_v0 }
  0x8b   : > { %304 = vst [vmem:[%s1883_s26 + $0x1c8] sm:$0xff] %v1638_v0 }
  0x8c   : > { %305 = vst [vmem:[%s1883_s26 + $0x1d0] sm:$0xff] %v1638_v0 }
  0x8d   : > { %306 = vst [vmem:[%s1883_s26 + $0x1d8] sm:$0xff] %v1638_v0 }
  0x8e   : > { %307 = vst [vmem:[%s1883_s26 + $0x1e0] sm:$0xff] %v1638_v0 }
  0x8f   : > { %308 = vst [vmem:[%s1883_s26 + $0x1e8] sm:$0xff] %v1638_v0 }
  0x90   : > { %309 = vst [vmem:[%s1883_s26 + $0x1f0] sm:$0xff] %v1638_v0 }
  0x91   : > { %310 = vst [vmem:[%s1883_s26 + $0x1f8] sm:$0xff] %v1638_v0 }
  0x92 PF: > { %v470_v1 = vld [vmem:[%s1874_s14 + $0xf8] sm:$0xff]  ;;  %v468_v3 = vld [vmem:[%s1874_s14 + $0xe8] sm:$0xff]  ;;  %v469_v7 = vld [vmem:[%s1874_s14 + $0xf0] sm:$0xff]  ;;  %s2390_s18 = sld [smem:[#allocation13_spill]]  ;;  %s1099_s3 = sshll.u32 %s1883_s26, 4  ;;  %s1100_s3 = int_to_ptr.vmem [resolvable:$true] %s1099_s3 }
  0x93   : > { %v502_v2 = vld [vmem:[%s1874_s14 + $0x1f8] sm:$0xff]  ;;  %729 = vmatpush.msra.mxu2 %v470_v1  ;;  %v500_v4 = vld [vmem:[%s1874_s14 + $0x1e8] sm:$0xff]  ;;  %v501_v8 = vld [vmem:[%s1874_s14 + $0x1f0] sm:$0xff]  ;;  %503 = vmatpush.msra.mxu0 %v469_v7  ;;  %s2391_s4 = sld [smem:[#allocation14_spill]] }
  0x94   : > { %842 = vmatpush.msra.mxu3 %v502_v2  ;;  %v466_v5 = vld [vmem:[%s1874_s14 + $0xd8] sm:$0xff]  ;;  %v467_v9 = vld [vmem:[%s1874_s14 + $0xe0] sm:$0xff]  ;;  %616 = vmatpush.msra.mxu1 %v501_v8  ;;  %v464_v11 = vld [vmem:[%s1874_s14 + $0xc8] sm:$0xff]  ;;  %s2392_s29 = sld [smem:[#allocation23_spill]] }
  0x95   : > { %v498_v6 = vld [vmem:[%s1874_s14 + $0x1d8] sm:$0xff]  ;;  %730 = vmatpush.msra.mxu2 %v468_v3  ;;  %v499_v10 = vld [vmem:[%s1874_s14 + $0x1e0] sm:$0xff]  ;;  %v496_v12 = vld [vmem:[%s1874_s14 + $0x1c8] sm:$0xff]  ;;  %504 = vmatpush.msra.mxu0 %v467_v9 }
  0x96   : > { %843 = vmatpush.msra.mxu3 %v500_v4  ;;  %v465_v13 = vld [vmem:[%s1874_s14 + $0xd0] sm:$0xff]  ;;  %617 = vmatpush.msra.mxu1 %v499_v10  ;;  %v462_v15 = vld [vmem:[%s1874_s14 + $0xb8] sm:$0xff]  ;;  %v463_v17 = vld [vmem:[%s1874_s14 + $0xc0] sm:$0xff] }
  0x97   : > { %731 = vmatpush.msra.mxu2 %v466_v5  ;;  %v497_v14 = vld [vmem:[%s1874_s14 + $0x1d0] sm:$0xff]  ;;  %v494_v16 = vld [vmem:[%s1874_s14 + $0x1b8] sm:$0xff]  ;;  %v495_v18 = vld [vmem:[%s1874_s14 + $0x1c0] sm:$0xff]  ;;  %505 = vmatpush.msra.mxu0 %v465_v13 }
  0x98   : > { %844 = vmatpush.msra.mxu3 %v498_v6  ;;  %618 = vmatpush.msra.mxu1 %v497_v14  ;;  %v460_v19 = vld [vmem:[%s1874_s14 + $0xa8] sm:$0xff]  ;;  %v461_v21 = vld [vmem:[%s1874_s14 + $0xb0] sm:$0xff]  ;;  %v458_v23 = vld [vmem:[%s1874_s14 + $0x98] sm:$0xff]  ;;  %s1245_s27 = sshll.u32 %s2390_s18, 1 }
  0x99   : > { %732 = vmatpush.msra.mxu2 %v464_v11  ;;  %v492_v20 = vld [vmem:[%s1874_s14 + $0x1a8] sm:$0xff]  ;;  %v493_v22 = vld [vmem:[%s1874_s14 + $0x1b0] sm:$0xff]  ;;  %506 = vmatpush.msra.mxu0 %v463_v17  ;;  %v490_v24 = vld [vmem:[%s1874_s14 + $0x198] sm:$0xff]  ;;  %s1252_s30 = sshll.u32 %s2391_s4, 7 }
  0x9a   : > { %845 = vmatpush.msra.mxu3 %v496_v12  ;;  %619 = vmatpush.msra.mxu1 %v495_v18  ;;  %v459_v25 = vld [vmem:[%s1874_s14 + $0xa0] sm:$0xff]  ;;  %v456_v27 = vld [vmem:[%s1874_s14 + $0x88] sm:$0xff]  ;;  %v457_v29 = vld [vmem:[%s1874_s14 + $0x90] sm:$0xff]  ;;  %s1096_s2 = sadd.s32 %s1252_s30, %s1245_s27  ;;  %s1487_s25 = scalar_lea.hbm %s2392_s29, 2048 }
  0x9b   : > { %733 = vmatpush.msra.mxu2 %v462_v15  ;;  %v491_v26 = vld [vmem:[%s1874_s14 + $0x1a0] sm:$0xff]  ;;  %507 = vmatpush.msra.mxu0 %v461_v21  ;;  %v488_v28 = vld [vmem:[%s1874_s14 + $0x188] sm:$0xff]  ;;  %v489_v30 = vld [vmem:[%s1874_s14 + $0x190] sm:$0xff]  ;;  %s1247_s8 = sshll.u32 %s1096_s2, 3 }
  0x9c   : > { %846 = vmatpush.msra.mxu3 %v494_v16  ;;  %620 = vmatpush.msra.mxu1 %v493_v22  ;;  %v454_v31 = vld [vmem:[%s1874_s14 + $0x78] sm:$0xff]  ;;  %v455_v33 = vld [vmem:[%s1874_s14 + $0x80] sm:$0xff]  ;;  %v452_v35 = vld [vmem:[%s1874_s14 + $0x68] sm:$0xff]  ;;  %s1098_s15 = scalar_lea.hbm %s2392_s29, %s1247_s8 }
  0x9d   : > { %734 = vmatpush.msra.mxu2 %v460_v19  ;;  %508 = vmatpush.msra.mxu0 %v459_v25  ;;  %v486_v32 = vld [vmem:[%s1874_s14 + $0x178] sm:$0xff]  ;;  %v487_v34 = vld [vmem:[%s1874_s14 + $0x180] sm:$0xff]  ;;  %v484_v36 = vld [vmem:[%s1874_s14 + $0x168] sm:$0xff]  ;;  %s1101_s6 = sshll.u32 %s1098_s15, 4  ;;  %s1102_s6 = int_to_ptr.hbm [resolvable:$true] %s1101_s6 }
  0x9e   : > { %847 = vmatpush.msra.mxu3 %v492_v20  ;;  %621 = vmatpush.msra.mxu1 %v491_v26  ;;  %v453_v37 = vld [vmem:[%s1874_s14 + $0x70] sm:$0xff]  ;;  %v450_v39 = vld [vmem:[%s1874_s14 + $0x58] sm:$0xff]  ;;  %v451_v41 = vld [vmem:[%s1874_s14 + $0x60] sm:$0xff]  ;;  %s1481_s23 = sshra.s32 %s1102_s6, 4  ;;  %s1482_s23 = int_to_ptr.hbm [resolvable:$true] %s1481_s23 }
  0x9f   : > { %735 = vmatpush.msra.mxu2 %v458_v23  ;;  %509 = vmatpush.msra.mxu0 %v457_v29  ;;  %v485_v38 = vld [vmem:[%s1874_s14 + $0x170] sm:$0xff]  ;;  %v482_v40 = vld [vmem:[%s1874_s14 + $0x158] sm:$0xff]  ;;  %v483_v42 = vld [vmem:[%s1874_s14 + $0x160] sm:$0xff]  ;;  %s1483_s20 = scalar_lea.hbm %s1482_s23, 512  ;;  %p1488_p3 = scmp.lt.s32.totalorder %s1482_s23, %s2392_s29 }
  0xa0   : > { %848 = vmatpush.msra.mxu3 %v490_v24  ;;  %622 = vmatpush.msra.mxu1 %v489_v30  ;;  %v448_v43 = vld [vmem:[%s1874_s14 + $0x48] sm:$0xff]  ;;  %v449_v45 = vld [vmem:[%s1874_s14 + $0x50] sm:$0xff]  ;;  %v446_v47 = vld [vmem:[%s1874_s14 + $0x38] sm:$0xff]  ;;  %p1484_p6 = scmp.ne.s32.totalorder %s1482_s23, %s1483_s20  ;;  %p1489_p0 = scmp.lt.s32.totalorder %s1487_s25, %s1483_s20 }
  0xa1   : > { %736 = vmatpush.msra.mxu2 %v456_v27  ;;  %510 = vmatpush.msra.mxu0 %v455_v33  ;;  %v480_v44 = vld [vmem:[%s1874_s14 + $0x148] sm:$0xff]  ;;  %v481_v46 = vld [vmem:[%s1874_s14 + $0x150] sm:$0xff]  ;;  %v478_v48 = vld [vmem:[%s1874_s14 + $0x138] sm:$0xff] }
  0xa2   : > { %849 = vmatpush.msra.mxu3 %v488_v28  ;;  %623 = vmatpush.msra.mxu1 %v487_v34  ;;  %v447_v49 = vld [vmem:[%s1874_s14 + $0x40] sm:$0xff]  ;;  %v444_v51 = vld [vmem:[%s1874_s14 + $0x28] sm:$0xff]  ;;  %v445_v53 = vld [vmem:[%s1874_s14 + $0x30] sm:$0xff]  ;;  %p1485_p7 = pnand %p1484_p6, %p1829_p4  ;;  %p1490_p11 = por %p1489_p0, %p1488_p3 }
  0xa3   : > { %737 = vmatpush.msra.mxu2 %v454_v31  ;;  %511 = vmatpush.msra.mxu0 %v453_v37  ;;  %v479_v50 = vld [vmem:[%s1874_s14 + $0x140] sm:$0xff]  ;;  %v476_v52 = vld [vmem:[%s1874_s14 + $0x128] sm:$0xff]  ;;  %v477_v54 = vld [vmem:[%s1874_s14 + $0x130] sm:$0xff] }
  0xa4   : > { %850 = vmatpush.msra.mxu3 %v486_v32  ;;  %624 = vmatpush.msra.mxu1 %v485_v38  ;;  %v442_v55 = vld [vmem:[%s1874_s14 + $0x18] sm:$0xff]  ;;  %v443_v57 = vld [vmem:[%s1874_s14 + $0x20] sm:$0xff]  ;;  %v440_v59 = vld [vmem:[%s1874_s14 + $0x8] sm:$0xff]  ;;  %p1486_p12 = pneg %p1485_p7 }
  0xa5   : > { %738 = vmatpush.msra.mxu2 %v452_v35  ;;  %512 = vmatpush.msra.mxu0 %v451_v41  ;;  %v474_v56 = vld [vmem:[%s1874_s14 + $0x118] sm:$0xff]  ;;  %v475_v58 = vld [vmem:[%s1874_s14 + $0x120] sm:$0xff]  ;;  %v472_v60 = vld [vmem:[%s1874_s14 + $0x108] sm:$0xff] }
  0xa6   : > { %851 = vmatpush.msra.mxu3 %v484_v36  ;;  %625 = vmatpush.msra.mxu1 %v483_v42  ;;  %v375_v61 = vld [vmem:[%s1867_s28] sm:$0xff]  ;;  %v376_v62 = vld [vmem:[%s1867_s28 + $0x8] sm:$0xff]  ;;  %v441_v63 = vld [vmem:[%s1874_s14 + $0x10] sm:$0xff]  ;;  %p1491_p13 = pnand %p1490_p11, %p1486_p12 }
  0xa7   : > { %739 = vmatpush.msra.mxu2 %v450_v39  ;;  %513 = vmatpush.msra.mxu0 %v449_v45  ;;  %v473_v0 = vld [vmem:[%s1874_s14 + $0x110] sm:$0xff]  ;;  %v439_v1 = vld [vmem:[%s1874_s14] sm:$0xff]  ;;  %v378_v4 = vld [vmem:[%s1867_s28 + $0x18] sm:$0xff] }
  0xa8   : > { %852 = vmatpush.msra.mxu3 %v482_v40  ;;  %626 = vmatpush.msra.mxu1 %v481_v46  ;;  %v471_v2 = vld [vmem:[%s1874_s14 + $0x100] sm:$0xff]  ;;  %v377_v3 = vld [vmem:[%s1867_s28 + $0x10] sm:$0xff]  ;;  %v380_v6 = vld [vmem:[%s1867_s28 + $0x28] sm:$0xff] }
  0xa9   : > { %740 = vmatpush.msra.mxu2 %v448_v43  ;;  %514 = vmatpush.msra.mxu0 %v447_v49  ;;  %v379_v5 = vld [vmem:[%s1867_s28 + $0x20] sm:$0xff]  ;;  %v381_v7 = vld [vmem:[%s1867_s28 + $0x30] sm:$0xff]  ;;  %v382_v8 = vld [vmem:[%s1867_s28 + $0x38] sm:$0xff] }
  0xaa   : > { %853 = vmatpush.msra.mxu3 %v480_v44  ;;  %627 = vmatpush.msra.mxu1 %v479_v50  ;;  %v383_v9 = vld [vmem:[%s1867_s28 + $0x40] sm:$0xff]  ;;  %v384_v10 = vld [vmem:[%s1867_s28 + $0x48] sm:$0xff]  ;;  %v385_v11 = vld [vmem:[%s1867_s28 + $0x50] sm:$0xff] }
  0xab   : > { %741 = vmatpush.msra.mxu2 %v446_v47  ;;  %515 = vmatpush.msra.mxu0 %v445_v53  ;;  %v386_v12 = vld [vmem:[%s1867_s28 + $0x58] sm:$0xff]  ;;  %v387_v13 = vld [vmem:[%s1867_s28 + $0x60] sm:$0xff]  ;;  %v388_v14 = vld [vmem:[%s1867_s28 + $0x68] sm:$0xff] }
  0xac   : > { %854 = vmatpush.msra.mxu3 %v478_v48  ;;  %628 = vmatpush.msra.mxu1 %v477_v54  ;;  %v389_v15 = vld [vmem:[%s1867_s28 + $0x70] sm:$0xff]  ;;  %v390_v16 = vld [vmem:[%s1867_s28 + $0x78] sm:$0xff]  ;;  %v391_v17 = vld [vmem:[%s1867_s28 + $0x80] sm:$0xff] }
  0xad   : > { %742 = vmatpush.msra.mxu2 %v444_v51  ;;  %516 = vmatpush.msra.mxu0 %v443_v57  ;;  %v392_v18 = vld [vmem:[%s1867_s28 + $0x88] sm:$0xff]  ;;  %v393_v19 = vld [vmem:[%s1867_s28 + $0x90] sm:$0xff]  ;;  %v394_v20 = vld [vmem:[%s1867_s28 + $0x98] sm:$0xff] }
  0xae   : > { %855 = vmatpush.msra.mxu3 %v476_v52  ;;  %629 = vmatpush.msra.mxu1 %v475_v58  ;;  %v395_v21 = vld [vmem:[%s1867_s28 + $0xa0] sm:$0xff]  ;;  %v396_v22 = vld [vmem:[%s1867_s28 + $0xa8] sm:$0xff]  ;;  %v397_v23 = vld [vmem:[%s1867_s28 + $0xb0] sm:$0xff] }
  0xaf   : > { %743 = vmatpush.msra.mxu2 %v442_v55  ;;  %517 = vmatpush.msra.mxu0 %v441_v63  ;;  %v398_v24 = vld [vmem:[%s1867_s28 + $0xb8] sm:$0xff]  ;;  %v399_v25 = vld [vmem:[%s1867_s28 + $0xc0] sm:$0xff]  ;;  %v400_v26 = vld [vmem:[%s1867_s28 + $0xc8] sm:$0xff] }
  0xb0   : > { %856 = vmatpush.msra.mxu3 %v474_v56  ;;  %630 = vmatpush.msra.mxu1 %v473_v0  ;;  %v401_v27 = vld [vmem:[%s1867_s28 + $0xd0] sm:$0xff]  ;;  %v402_v28 = vld [vmem:[%s1867_s28 + $0xd8] sm:$0xff]  ;;  %v403_v29 = vld [vmem:[%s1867_s28 + $0xe0] sm:$0xff] }
  0xb1   : > { %744 = vmatpush.msra.mxu2 %v440_v59  ;;  %518 = vmatpush.msra.mxu0 %v439_v1  ;;  %v404_v30 = vld [vmem:[%s1867_s28 + $0xe8] sm:$0xff]  ;;  %v405_v31 = vld [vmem:[%s1867_s28 + $0xf0] sm:$0xff]  ;;  %v406_v32 = vld [vmem:[%s1867_s28 + $0xf8] sm:$0xff] }
  0xb2   : > { %857 = vmatpush.msra.mxu3 %v472_v60  ;;  %745 = vmatmul.f32.vlgmr.msra.gmra.mxu2 %v375_v61  ;;  %v407_v33 = vld [vmem:[%s1867_s28 + $0x100] sm:$0xff]  ;;  %v408_v34 = vld [vmem:[%s1867_s28 + $0x108] sm:$0xff]  ;;  %v409_v44 = vld [vmem:[%s1867_s28 + $0x110] sm:$0xff] }
  0xb3   : > { %858 = vmatmul.f32.vlgmr.msra.gmra.mxu3 %v376_v62  ;;  %631 = vmatpush.msra.mxu1 %v471_v2  ;;  %v311_v36 = vld [vmem:[%s1883_s26] sm:$0xff]  ;;  %v312_v40 = vld [vmem:[%s1883_s26 + $0x8] sm:$0xff]  ;;  %v410_v45 = vld [vmem:[%s1867_s28 + $0x118] sm:$0xff] }
  0xb4   : > { %519 = vmatmul.f32.vlgmr.msra.gmra.mxu0 %v375_v61  ;;  %632 = vmatmul.f32.vlgmr.msra.gmra.mxu1 %v376_v62  ;;  %v313_v48 = vld [vmem:[%s1883_s26 + $0x10] sm:$0xff]  ;;  %v314_v52 = vld [vmem:[%s1883_s26 + $0x18] sm:$0xff]  ;;  %v411_v56 = vld [vmem:[%s1867_s28 + $0x120] sm:$0xff] }
  0xb5   : > { %v412_v57 = vld [vmem:[%s1867_s28 + $0x128] sm:$0xff]  ;;  %v315_v60 = vld [vmem:[%s1883_s26 + $0x20] sm:$0xff] }
  0xb6   : > { %v316_v0 = vld [vmem:[%s1883_s26 + $0x28] sm:$0xff] }
  0xba   : > { %748 = vmatmul.f32.gmra.mxu2 %v377_v3 }
  0xbb   : > { %861 = vmatmul.f32.gmra.mxu3 %v378_v4 }
  0xbc   : > { %522 = vmatmul.f32.gmra.mxu0 %v377_v3  ;;  %635 = vmatmul.f32.gmra.mxu1 %v378_v4  ;;  %v413_v4 = vld [vmem:[%s1867_s28 + $0x130] sm:$0xff] }
  0xc2   : > { %751 = vmatmul.f32.gmra.mxu2 %v379_v5 }
  0xc3   : > { %864 = vmatmul.f32.gmra.mxu3 %v380_v6 }
  0xc4   : > { %525 = vmatmul.f32.gmra.mxu0 %v379_v5  ;;  %638 = vmatmul.f32.gmra.mxu1 %v380_v6  ;;  %v414_v5 = vld [vmem:[%s1867_s28 + $0x138] sm:$0xff] }
  0xca   : > { %754 = vmatmul.f32.gmra.mxu2 %v381_v7 }
  0xcb   : > { %867 = vmatmul.f32.gmra.mxu3 %v382_v8 }
  0xcc   : > { %528 = vmatmul.f32.gmra.mxu0 %v381_v7  ;;  %641 = vmatmul.f32.gmra.mxu1 %v382_v8  ;;  %v317_v8 = vld [vmem:[%s1883_s26 + $0x30] sm:$0xff] }
  0xd2   : > { %757 = vmatmul.f32.gmra.mxu2 %v383_v9 }
  0xd3   : > { %870 = vmatmul.f32.gmra.mxu3 %v384_v10 }
  0xd4   : > { %531 = vmatmul.f32.gmra.mxu0 %v383_v9  ;;  %644 = vmatmul.f32.gmra.mxu1 %v384_v10 }
  0xda   : > { %760 = vmatmul.f32.gmra.mxu2 %v385_v11 }
  0xdb   : > { %873 = vmatmul.f32.gmra.mxu3 %v386_v12 }
  0xdc   : > { %534 = vmatmul.f32.gmra.mxu0 %v385_v11  ;;  %647 = vmatmul.f32.gmra.mxu1 %v386_v12  ;;  %v318_v12 = vld [vmem:[%s1883_s26 + $0x38] sm:$0xff] }
  0xe2   : > { %763 = vmatmul.f32.gmra.mxu2 %v387_v13 }
  0xe3   : > { %876 = vmatmul.f32.gmra.mxu3 %v388_v14 }
  0xe4   : > { %537 = vmatmul.f32.gmra.mxu0 %v387_v13  ;;  %650 = vmatmul.f32.gmra.mxu1 %v388_v14 }
  0xea   : > { %766 = vmatmul.f32.gmra.mxu2 %v389_v15 }
  0xeb   : > { %879 = vmatmul.f32.gmra.mxu3 %v390_v16 }
  0xec   : > { %540 = vmatmul.f32.gmra.mxu0 %v389_v15  ;;  %653 = vmatmul.f32.gmra.mxu1 %v390_v16  ;;  %v415_v16 = vld [vmem:[%s1867_s28 + $0x140] sm:$0xff] }
  0xf2   : > { %769 = vmatmul.f32.gmra.mxu2 %v391_v17 }
  0xf3   : > { %882 = vmatmul.f32.gmra.mxu3 %v392_v18 }
  0xf4   : > { %543 = vmatmul.f32.gmra.mxu0 %v391_v17  ;;  %656 = vmatmul.f32.gmra.mxu1 %v392_v18  ;;  %v416_v17 = vld [vmem:[%s1867_s28 + $0x148] sm:$0xff] }
  0xfa   : > { %772 = vmatmul.f32.gmra.mxu2 %v393_v19 }
  0xfb   : > { %885 = vmatmul.f32.gmra.mxu3 %v394_v20 }
  0xfc   : > { %546 = vmatmul.f32.gmra.mxu0 %v393_v19  ;;  %659 = vmatmul.f32.gmra.mxu1 %v394_v20  ;;  %v319_v20 = vld [vmem:[%s1883_s26 + $0x40] sm:$0xff] }
 0x102   : > { %775 = vmatmul.f32.gmra.mxu2 %v395_v21 }
 0x103   : > { %888 = vmatmul.f32.gmra.mxu3 %v396_v22 }
 0x104   : > { %549 = vmatmul.f32.gmra.mxu0 %v395_v21  ;;  %662 = vmatmul.f32.gmra.mxu1 %v396_v22 }
 0x10a   : > { %778 = vmatmul.f32.gmra.mxu2 %v397_v23 }
 0x10b   : > { %891 = vmatmul.f32.gmra.mxu3 %v398_v24 }
 0x10c   : > { %552 = vmatmul.f32.gmra.mxu0 %v397_v23  ;;  %665 = vmatmul.f32.gmra.mxu1 %v398_v24  ;;  %v320_v24 = vld [vmem:[%s1883_s26 + $0x48] sm:$0xff] }
 0x112   : > { %781 = vmatmul.f32.gmra.mxu2 %v399_v25 }
 0x113   : > { %894 = vmatmul.f32.gmra.mxu3 %v400_v26 }
 0x114   : > { %555 = vmatmul.f32.gmra.mxu0 %v399_v25  ;;  %668 = vmatmul.f32.gmra.mxu1 %v400_v26 }
 0x11a   : > { %784 = vmatmul.f32.gmra.mxu2 %v401_v27 }
 0x11b   : > { %897 = vmatmul.f32.gmra.mxu3 %v402_v28 }
 0x11c   : > { %558 = vmatmul.f32.gmra.mxu0 %v401_v27  ;;  %671 = vmatmul.f32.gmra.mxu1 %v402_v28  ;;  %v417_v28 = vld [vmem:[%s1867_s28 + $0x150] sm:$0xff] }
 0x122   : > { %787 = vmatmul.f32.gmra.mxu2 %v403_v29 }
 0x123   : > { %900 = vmatmul.f32.gmra.mxu3 %v404_v30 }
 0x124   : > { %561 = vmatmul.f32.gmra.mxu0 %v403_v29  ;;  %674 = vmatmul.f32.gmra.mxu1 %v404_v30  ;;  %v418_v29 = vld [vmem:[%s1867_s28 + $0x158] sm:$0xff] }
 0x12a   : > { %790 = vmatmul.f32.gmra.mxu2 %v405_v31 }
 0x12b   : > { %903 = vmatmul.f32.gmra.mxu3 %v406_v32 }
 0x12c   : > { %564 = vmatmul.f32.gmra.mxu0 %v405_v31  ;;  %677 = vmatmul.f32.gmra.mxu1 %v406_v32  ;;  %v321_v32 = vld [vmem:[%s1883_s26 + $0x50] sm:$0xff] }
 0x131   : > { %v520_v35 = vpop.f32.mrf.mxu0  ;;  %v633_v37 = vpop.f32.mrf.mxu1 }
 0x132   : > { %793 = vmatmul.f32.gmra.mxu2 %v407_v33  ;;  %v634_v38 = vadd.f32 %v633_v37, %v520_v35 }
 0x133   : > { %906 = vmatmul.f32.gmra.mxu3 %v408_v34 }
 0x134   : > { %v955_v42 = vadd.f32 %v634_v38, %v311_v36  ;;  %567 = vmatmul.f32.gmra.mxu0 %v407_v33  ;;  %680 = vmatmul.f32.gmra.mxu1 %v408_v34  ;;  %v322_v36 = vld [vmem:[%s1883_s26 + $0x58] sm:$0xff] }
 0x135   : > { %v746_v39 = vpop.f32.mrf.mxu2 }
 0x136   : > { %v859_v41 = vpop.f32.mrf.mxu3  ;;  %1019 = vst [vmem:[%s1883_s26] sm:$0xff] %v955_v42 }
 0x137   : > { %v860_v43 = vadd.f32 %v859_v41, %v746_v39  ;;  %v420_v41 = vld [vmem:[%s1867_s28 + $0x168] sm:$0xff] }
 0x139   : > { %v956_v46 = vadd.f32 %v860_v43, %v312_v40  ;;  %v523_v47 = vpop.f32.mrf.mxu0  ;;  %v636_v49 = vpop.f32.mrf.mxu1  ;;  %v419_v40 = vld [vmem:[%s1867_s28 + $0x160] sm:$0xff] }
 0x13a   : > { %796 = vmatmul.f32.gmra.mxu2 %v409_v44  ;;  %v637_v50 = vadd.f32 %v636_v49, %v523_v47 }
 0x13b   : > { %1020 = vst [vmem:[%s1883_s26 + $0x8] sm:$0xff] %v956_v46  ;;  %909 = vmatmul.f32.gmra.mxu3 %v410_v45 }
 0x13c   : > { %v957_v54 = vadd.f32 %v637_v50, %v313_v48  ;;  %570 = vmatmul.f32.gmra.mxu0 %v409_v44  ;;  %683 = vmatmul.f32.gmra.mxu1 %v410_v45  ;;  %v323_v44 = vld [vmem:[%s1883_s26 + $0x60] sm:$0xff]  ;;  %v324_v48 = vld [vmem:[%s1883_s26 + $0x68] sm:$0xff] }
 0x13d   : > { %v749_v51 = vpop.f32.mrf.mxu2 }
 0x13e   : > { %v862_v53 = vpop.f32.mrf.mxu3  ;;  %1021 = vst [vmem:[%s1883_s26 + $0x10] sm:$0xff] %v957_v54 }
 0x13f   : > { %v863_v55 = vadd.f32 %v862_v53, %v749_v51  ;;  %v422_v53 = vld [vmem:[%s1867_s28 + $0x178] sm:$0xff] }
 0x141   : > { %v958_v58 = vadd.f32 %v863_v55, %v314_v52  ;;  %v526_v59 = vpop.f32.mrf.mxu0  ;;  %v639_v61 = vpop.f32.mrf.mxu1  ;;  %v421_v52 = vld [vmem:[%s1867_s28 + $0x170] sm:$0xff] }
 0x142   : > { %799 = vmatmul.f32.gmra.mxu2 %v411_v56  ;;  %v640_v62 = vadd.f32 %v639_v61, %v526_v59 }
 0x143   : > { %1022 = vst [vmem:[%s1883_s26 + $0x18] sm:$0xff] %v958_v58  ;;  %912 = vmatmul.f32.gmra.mxu3 %v412_v57 }
 0x144   : > { %v959_v2 = vadd.f32 %v640_v62, %v315_v60  ;;  %573 = vmatmul.f32.gmra.mxu0 %v411_v56  ;;  %686 = vmatmul.f32.gmra.mxu1 %v412_v57  ;;  %v325_v56 = vld [vmem:[%s1883_s26 + $0x70] sm:$0xff]  ;;  %v326_v60 = vld [vmem:[%s1883_s26 + $0x78] sm:$0xff] }
 0x145   : > { %v752_v63 = vpop.f32.mrf.mxu2 }
 0x146   : > { %v865_v1 = vpop.f32.mrf.mxu3  ;;  %1023 = vst [vmem:[%s1883_s26 + $0x20] sm:$0xff] %v959_v2 }
 0x147   : > { %v866_v3 = vadd.f32 %v865_v1, %v752_v63  ;;  %v424_v1 = vld [vmem:[%s1867_s28 + $0x188] sm:$0xff] }
 0x149   : > { %v960_v6 = vadd.f32 %v866_v3, %v316_v0  ;;  %v529_v7 = vpop.f32.mrf.mxu0  ;;  %v642_v9 = vpop.f32.mrf.mxu1  ;;  %v423_v0 = vld [vmem:[%s1867_s28 + $0x180] sm:$0xff] }
 0x14a   : > { %802 = vmatmul.f32.gmra.mxu2 %v413_v4  ;;  %v643_v10 = vadd.f32 %v642_v9, %v529_v7 }
 0x14b   : > { %1024 = vst [vmem:[%s1883_s26 + $0x28] sm:$0xff] %v960_v6  ;;  %915 = vmatmul.f32.gmra.mxu3 %v414_v5 }
 0x14c   : > { %v961_v14 = vadd.f32 %v643_v10, %v317_v8  ;;  %576 = vmatmul.f32.gmra.mxu0 %v413_v4  ;;  %689 = vmatmul.f32.gmra.mxu1 %v414_v5  ;;  %v327_v4 = vld [vmem:[%s1883_s26 + $0x80] sm:$0xff]  ;;  %v328_v8 = vld [vmem:[%s1883_s26 + $0x88] sm:$0xff] }
 0x14d   : > { %v755_v11 = vpop.f32.mrf.mxu2 }
 0x14e   : > { %v868_v13 = vpop.f32.mrf.mxu3  ;;  %1025 = vst [vmem:[%s1883_s26 + $0x30] sm:$0xff] %v961_v14 }
 0x14f   : > { %v869_v15 = vadd.f32 %v868_v13, %v755_v11  ;;  %v426_v13 = vld [vmem:[%s1867_s28 + $0x198] sm:$0xff] }
 0x151   : > { %v962_v18 = vadd.f32 %v869_v15, %v318_v12  ;;  %v532_v19 = vpop.f32.mrf.mxu0  ;;  %v645_v21 = vpop.f32.mrf.mxu1  ;;  %v425_v12 = vld [vmem:[%s1867_s28 + $0x190] sm:$0xff] }
 0x152   : > { %805 = vmatmul.f32.gmra.mxu2 %v415_v16  ;;  %v646_v22 = vadd.f32 %v645_v21, %v532_v19 }
 0x153   : > { %1026 = vst [vmem:[%s1883_s26 + $0x38] sm:$0xff] %v962_v18  ;;  %918 = vmatmul.f32.gmra.mxu3 %v416_v17 }
 0x154   : > { %v963_v26 = vadd.f32 %v646_v22, %v319_v20  ;;  %579 = vmatmul.f32.gmra.mxu0 %v415_v16  ;;  %692 = vmatmul.f32.gmra.mxu1 %v416_v17  ;;  %v329_v16 = vld [vmem:[%s1883_s26 + $0x90] sm:$0xff]  ;;  %v330_v20 = vld [vmem:[%s1883_s26 + $0x98] sm:$0xff] }
 0x155   : > { %v758_v23 = vpop.f32.mrf.mxu2 }
 0x156   : > { %v871_v25 = vpop.f32.mrf.mxu3  ;;  %1027 = vst [vmem:[%s1883_s26 + $0x40] sm:$0xff] %v963_v26 }
 0x157   : > { %v872_v27 = vadd.f32 %v871_v25, %v758_v23  ;;  %v428_v25 = vld [vmem:[%s1867_s28 + $0x1a8] sm:$0xff] }
 0x159   : > { %v964_v30 = vadd.f32 %v872_v27, %v320_v24  ;;  %v535_v31 = vpop.f32.mrf.mxu0  ;;  %v648_v33 = vpop.f32.mrf.mxu1  ;;  %v427_v24 = vld [vmem:[%s1867_s28 + $0x1a0] sm:$0xff] }
 0x15a   : > { %808 = vmatmul.f32.gmra.mxu2 %v417_v28  ;;  %v649_v34 = vadd.f32 %v648_v33, %v535_v31 }
 0x15b   : > { %1028 = vst [vmem:[%s1883_s26 + $0x48] sm:$0xff] %v964_v30  ;;  %921 = vmatmul.f32.gmra.mxu3 %v418_v29 }
 0x15c   : > { %v965_v38 = vadd.f32 %v649_v34, %v321_v32  ;;  %582 = vmatmul.f32.gmra.mxu0 %v417_v28  ;;  %695 = vmatmul.f32.gmra.mxu1 %v418_v29  ;;  %v331_v28 = vld [vmem:[%s1883_s26 + $0xa0] sm:$0xff]  ;;  %v332_v32 = vld [vmem:[%s1883_s26 + $0xa8] sm:$0xff] }
 0x15d   : > { %v761_v35 = vpop.f32.mrf.mxu2 }
 0x15e   : > { %v874_v37 = vpop.f32.mrf.mxu3  ;;  %1029 = vst [vmem:[%s1883_s26 + $0x50] sm:$0xff] %v965_v38 }
 0x15f   : > { %v875_v39 = vadd.f32 %v874_v37, %v761_v35  ;;  %v430_v37 = vld [vmem:[%s1867_s28 + $0x1b8] sm:$0xff] }
 0x161   : > { %v966_v42 = vadd.f32 %v875_v39, %v322_v36  ;;  %v538_v43 = vpop.f32.mrf.mxu0  ;;  %v651_v45 = vpop.f32.mrf.mxu1  ;;  %v429_v36 = vld [vmem:[%s1867_s28 + $0x1b0] sm:$0xff] }
 0x162   : > { %811 = vmatmul.f32.gmra.mxu2 %v419_v40  ;;  %v652_v46 = vadd.f32 %v651_v45, %v538_v43 }
 0x163   : > { %1030 = vst [vmem:[%s1883_s26 + $0x58] sm:$0xff] %v966_v42  ;;  %924 = vmatmul.f32.gmra.mxu3 %v420_v41 }
 0x164   : > { %v967_v50 = vadd.f32 %v652_v46, %v323_v44  ;;  %585 = vmatmul.f32.gmra.mxu0 %v419_v40  ;;  %698 = vmatmul.f32.gmra.mxu1 %v420_v41  ;;  %v333_v40 = vld [vmem:[%s1883_s26 + $0xb0] sm:$0xff]  ;;  %v334_v44 = vld [vmem:[%s1883_s26 + $0xb8] sm:$0xff] }
 0x165   : > { %v764_v47 = vpop.f32.mrf.mxu2 }
 0x166   : > { %v877_v49 = vpop.f32.mrf.mxu3  ;;  %1031 = vst [vmem:[%s1883_s26 + $0x60] sm:$0xff] %v967_v50 }
 0x167   : > { %v878_v51 = vadd.f32 %v877_v49, %v764_v47  ;;  %v432_v49 = vld [vmem:[%s1867_s28 + $0x1c8] sm:$0xff] }
 0x169   : > { %v968_v54 = vadd.f32 %v878_v51, %v324_v48  ;;  %v541_v55 = vpop.f32.mrf.mxu0  ;;  %v654_v57 = vpop.f32.mrf.mxu1  ;;  %v431_v48 = vld [vmem:[%s1867_s28 + $0x1c0] sm:$0xff] }
 0x16a   : > { %814 = vmatmul.f32.gmra.mxu2 %v421_v52  ;;  %v655_v58 = vadd.f32 %v654_v57, %v541_v55 }
 0x16b   : > { %1032 = vst [vmem:[%s1883_s26 + $0x68] sm:$0xff] %v968_v54  ;;  %927 = vmatmul.f32.gmra.mxu3 %v422_v53 }
 0x16c   : > { %v969_v62 = vadd.f32 %v655_v58, %v325_v56  ;;  %588 = vmatmul.f32.gmra.mxu0 %v421_v52  ;;  %701 = vmatmul.f32.gmra.mxu1 %v422_v53  ;;  %v335_v52 = vld [vmem:[%s1883_s26 + $0xc0] sm:$0xff]  ;;  %v336_v56 = vld [vmem:[%s1883_s26 + $0xc8] sm:$0xff] }
 0x16d   : > { %v767_v59 = vpop.f32.mrf.mxu2 }
 0x16e   : > { %v880_v61 = vpop.f32.mrf.mxu3  ;;  %1033 = vst [vmem:[%s1883_s26 + $0x70] sm:$0xff] %v969_v62 }
 0x16f   : > { %v881_v63 = vadd.f32 %v880_v61, %v767_v59  ;;  %v434_v61 = vld [vmem:[%s1867_s28 + $0x1d8] sm:$0xff] }
 0x171   : > { %v970_v2 = vadd.f32 %v881_v63, %v326_v60  ;;  %v544_v3 = vpop.f32.mrf.mxu0  ;;  %v657_v5 = vpop.f32.mrf.mxu1  ;;  %v433_v60 = vld [vmem:[%s1867_s28 + $0x1d0] sm:$0xff] }
 0x172   : > { %817 = vmatmul.f32.gmra.mxu2 %v423_v0  ;;  %v658_v6 = vadd.f32 %v657_v5, %v544_v3 }
 0x173   : > { %1034 = vst [vmem:[%s1883_s26 + $0x78] sm:$0xff] %v970_v2  ;;  %930 = vmatmul.f32.gmra.mxu3 %v424_v1 }
 0x174   : > { %v971_v10 = vadd.f32 %v658_v6, %v327_v4  ;;  %591 = vmatmul.f32.gmra.mxu0 %v423_v0  ;;  %704 = vmatmul.f32.gmra.mxu1 %v424_v1  ;;  %v337_v0 = vld [vmem:[%s1883_s26 + $0xd0] sm:$0xff]  ;;  %v338_v4 = vld [vmem:[%s1883_s26 + $0xd8] sm:$0xff] }
 0x175   : > { %v770_v7 = vpop.f32.mrf.mxu2 }
 0x176   : > { %v883_v9 = vpop.f32.mrf.mxu3  ;;  %1035 = vst [vmem:[%s1883_s26 + $0x80] sm:$0xff] %v971_v10 }
 0x177   : > { %v884_v11 = vadd.f32 %v883_v9, %v770_v7  ;;  %v436_v9 = vld [vmem:[%s1867_s28 + $0x1e8] sm:$0xff] }
 0x179   : > { %v972_v14 = vadd.f32 %v884_v11, %v328_v8  ;;  %v547_v15 = vpop.f32.mrf.mxu0  ;;  %v660_v17 = vpop.f32.mrf.mxu1  ;;  %v435_v8 = vld [vmem:[%s1867_s28 + $0x1e0] sm:$0xff] }
 0x17a   : > { %820 = vmatmul.f32.gmra.mxu2 %v425_v12  ;;  %v661_v18 = vadd.f32 %v660_v17, %v547_v15 }
 0x17b   : > { %1036 = vst [vmem:[%s1883_s26 + $0x88] sm:$0xff] %v972_v14  ;;  %933 = vmatmul.f32.gmra.mxu3 %v426_v13 }
 0x17c   : > { %v973_v22 = vadd.f32 %v661_v18, %v329_v16  ;;  %594 = vmatmul.f32.gmra.mxu0 %v425_v12  ;;  %707 = vmatmul.f32.gmra.mxu1 %v426_v13  ;;  %v339_v12 = vld [vmem:[%s1883_s26 + $0xe0] sm:$0xff]  ;;  %v340_v16 = vld [vmem:[%s1883_s26 + $0xe8] sm:$0xff] }
 0x17d   : > { %v773_v19 = vpop.f32.mrf.mxu2 }
 0x17e   : > { %v886_v21 = vpop.f32.mrf.mxu3  ;;  %1037 = vst [vmem:[%s1883_s26 + $0x90] sm:$0xff] %v973_v22 }
 0x17f   : > { %v887_v23 = vadd.f32 %v886_v21, %v773_v19  ;;  %v438_v21 = vld [vmem:[%s1867_s28 + $0x1f8] sm:$0xff] }
 0x181   : > { %v974_v26 = vadd.f32 %v887_v23, %v330_v20  ;;  %v550_v27 = vpop.f32.mrf.mxu0  ;;  %v663_v29 = vpop.f32.mrf.mxu1  ;;  %v437_v20 = vld [vmem:[%s1867_s28 + $0x1f0] sm:$0xff]  ;;  %s1084_s28 = scalar_lea.sflag [#allocation4], %s234_s17 }
 0x182   : > { %823 = vmatmul.f32.gmra.mxu2 %v427_v24  ;;  %v664_v30 = vadd.f32 %v663_v29, %v550_v27 }
 0x183   : > { %1038 = vst [vmem:[%s1883_s26 + $0x98] sm:$0xff] %v974_v26  ;;  %936 = vmatmul.f32.gmra.mxu3 %v428_v25 }
 0x184   : > { %v975_v34 = vadd.f32 %v664_v30, %v331_v28  ;;  %597 = vmatmul.f32.gmra.mxu0 %v427_v24  ;;  %710 = vmatmul.f32.gmra.mxu1 %v428_v25  ;;  %v341_v24 = vld [vmem:[%s1883_s26 + $0xf0] sm:$0xff]  ;;  %v342_v28 = vld [vmem:[%s1883_s26 + $0xf8] sm:$0xff] }
 0x185   : > { %v776_v31 = vpop.f32.mrf.mxu2 }
 0x186   : > { %v889_v33 = vpop.f32.mrf.mxu3  ;;  %1039 = vst [vmem:[%s1883_s26 + $0xa0] sm:$0xff] %v975_v34  ;;  %v343_v34 = vld [vmem:[%s1883_s26 + $0x100] sm:$0xff] }
 0x187   : > { %v890_v35 = vadd.f32 %v889_v33, %v776_v31 }
 0x189   : > { %v976_v38 = vadd.f32 %v890_v35, %v332_v32  ;;  %v553_v39 = vpop.f32.mrf.mxu0  ;;  %v666_v41 = vpop.f32.mrf.mxu1 }
 0x18a   : > { %826 = vmatmul.f32.gmra.mxu2 %v429_v36  ;;  %v667_v42 = vadd.f32 %v666_v41, %v553_v39 }
 0x18b   : > { %1040 = vst [vmem:[%s1883_s26 + $0xa8] sm:$0xff] %v976_v38  ;;  %939 = vmatmul.f32.gmra.mxu3 %v430_v37  ;;  %v344_v38 = vld [vmem:[%s1883_s26 + $0x108] sm:$0xff] }
 0x18c   : > { %v977_v46 = vadd.f32 %v667_v42, %v333_v40  ;;  %600 = vmatmul.f32.gmra.mxu0 %v429_v36  ;;  %713 = vmatmul.f32.gmra.mxu1 %v430_v37 }
 0x18d   : > { %v779_v43 = vpop.f32.mrf.mxu2 }
 0x18e   : > { %v892_v45 = vpop.f32.mrf.mxu3  ;;  %1041 = vst [vmem:[%s1883_s26 + $0xb0] sm:$0xff] %v977_v46 }
 0x18f   : > { %v893_v47 = vadd.f32 %v892_v45, %v779_v43 }
 0x191   : > { %v978_v50 = vadd.f32 %v893_v47, %v334_v44  ;;  %v556_v51 = vpop.f32.mrf.mxu0  ;;  %v669_v53 = vpop.f32.mrf.mxu1  ;;  %v345_v44 = vld [vmem:[%s1883_s26 + $0x110] sm:$0xff] }
 0x192   : > { %829 = vmatmul.f32.gmra.mxu2 %v431_v48  ;;  %v670_v54 = vadd.f32 %v669_v53, %v556_v51 }
 0x193   : > { %1042 = vst [vmem:[%s1883_s26 + $0xb8] sm:$0xff] %v978_v50  ;;  %942 = vmatmul.f32.gmra.mxu3 %v432_v49 }
 0x194   : > { %v979_v58 = vadd.f32 %v670_v54, %v335_v52  ;;  %603 = vmatmul.f32.gmra.mxu0 %v431_v48  ;;  %716 = vmatmul.f32.gmra.mxu1 %v432_v49  ;;  %v346_v48 = vld [vmem:[%s1883_s26 + $0x118] sm:$0xff]  ;;  %v347_v54 = vld [vmem:[%s1883_s26 + $0x120] sm:$0xff] }
 0x195   : > { %v782_v55 = vpop.f32.mrf.mxu2 }
 0x196   : > { %v895_v57 = vpop.f32.mrf.mxu3  ;;  %1043 = vst [vmem:[%s1883_s26 + $0xc0] sm:$0xff] %v979_v58  ;;  %v348_v58 = vld [vmem:[%s1883_s26 + $0x128] sm:$0xff] }
 0x197   : > { %v896_v59 = vadd.f32 %v895_v57, %v782_v55 }
 0x199   : > { %v980_v62 = vadd.f32 %v896_v59, %v336_v56  ;;  %v559_v63 = vpop.f32.mrf.mxu0  ;;  %v672_v1 = vpop.f32.mrf.mxu1 }
 0x19a   : > { %832 = vmatmul.f32.gmra.mxu2 %v433_v60  ;;  %v673_v2 = vadd.f32 %v672_v1, %v559_v63 }
 0x19b   : > { %1044 = vst [vmem:[%s1883_s26 + $0xc8] sm:$0xff] %v980_v62  ;;  %945 = vmatmul.f32.gmra.mxu3 %v434_v61 }
 0x19c   : > { %v981_v6 = vadd.f32 %v673_v2, %v337_v0  ;;  %606 = vmatmul.f32.gmra.mxu0 %v433_v60  ;;  %719 = vmatmul.f32.gmra.mxu1 %v434_v61  ;;  %v349_v0 = vld [vmem:[%s1883_s26 + $0x130] sm:$0xff] }
 0x19d   : > { %v785_v3 = vpop.f32.mrf.mxu2 }
 0x19e   : > { %v898_v5 = vpop.f32.mrf.mxu3  ;;  %1045 = vst [vmem:[%s1883_s26 + $0xd0] sm:$0xff] %v981_v6 }
 0x19f   : > { %v899_v7 = vadd.f32 %v898_v5, %v785_v3 }
 0x1a1   : > { %v982_v10 = vadd.f32 %v899_v7, %v338_v4  ;;  %v562_v11 = vpop.f32.mrf.mxu0  ;;  %v675_v13 = vpop.f32.mrf.mxu1  ;;  %v350_v4 = vld [vmem:[%s1883_s26 + $0x138] sm:$0xff] }
 0x1a2   : > { %835 = vmatmul.f32.gmra.mxu2 %v435_v8  ;;  %v676_v14 = vadd.f32 %v675_v13, %v562_v11 }
 0x1a3   : > { %1046 = vst [vmem:[%s1883_s26 + $0xd8] sm:$0xff] %v982_v10  ;;  %948 = vmatmul.f32.gmra.mxu3 %v436_v9  ;;  %v351_v10 = vld [vmem:[%s1883_s26 + $0x140] sm:$0xff] }
 0x1a4   : > { %v983_v18 = vadd.f32 %v676_v14, %v339_v12  ;;  %609 = vmatmul.f32.gmra.mxu0 %v435_v8  ;;  %722 = vmatmul.f32.gmra.mxu1 %v436_v9  ;;  %v352_v14 = vld [vmem:[%s1883_s26 + $0x148] sm:$0xff] }
 0x1a5   : > { %v788_v15 = vpop.f32.mrf.mxu2 }
 0x1a6   : > { %v901_v17 = vpop.f32.mrf.mxu3  ;;  %1047 = vst [vmem:[%s1883_s26 + $0xe0] sm:$0xff] %v983_v18 }
 0x1a7   : > { %v902_v19 = vadd.f32 %v901_v17, %v788_v15 }
 0x1a9   : > { %v984_v22 = vadd.f32 %v902_v19, %v340_v16  ;;  %v565_v23 = vpop.f32.mrf.mxu0  ;;  %v678_v25 = vpop.f32.mrf.mxu1 }
 0x1aa   : > { %838 = vmatmul.f32.gmra.mxu2 %v437_v20  ;;  %v679_v26 = vadd.f32 %v678_v25, %v565_v23 }
 0x1ab   : > { %1048 = vst [vmem:[%s1883_s26 + $0xe8] sm:$0xff] %v984_v22  ;;  %951 = vmatmul.f32.gmra.mxu3 %v438_v21 }
 0x1ac   : > { %v985_v30 = vadd.f32 %v679_v26, %v341_v24  ;;  %612 = vmatmul.f32.gmra.mxu0 %v437_v20  ;;  %725 = vmatmul.f32.gmra.mxu1 %v438_v21  ;;  %v353_v20 = vld [vmem:[%s1883_s26 + $0x150] sm:$0xff]  ;;  %v354_v24 = vld [vmem:[%s1883_s26 + $0x158] sm:$0xff] }
 0x1ad   : > { %v791_v27 = vpop.f32.mrf.mxu2 }
 0x1ae   : > { %v904_v29 = vpop.f32.mrf.mxu3  ;;  %1049 = vst [vmem:[%s1883_s26 + $0xf0] sm:$0xff] %v985_v30  ;;  %v355_v30 = vld [vmem:[%s1883_s26 + $0x160] sm:$0xff] }
 0x1af   : > { %v905_v31 = vadd.f32 %v904_v29, %v791_v27 }
 0x1b1   : > { %v986_v32 = vadd.f32 %v905_v31, %v342_v28  ;;  %v568_v33 = vpop.f32.mrf.mxu0  ;;  %v681_v35 = vpop.f32.mrf.mxu1 }
 0x1b2   : > { %v682_v36 = vadd.f32 %v681_v35, %v568_v33 }
 0x1b3   : > { %1050 = vst [vmem:[%s1883_s26 + $0xf8] sm:$0xff] %v986_v32 }
 0x1b4   : > { %v987_v40 = vadd.f32 %v682_v36, %v343_v34  ;;  %v356_v34 = vld [vmem:[%s1883_s26 + $0x168] sm:$0xff] }
 0x1b5   : > { %v794_v37 = vpop.f32.mrf.mxu2 }
 0x1b6   : > { %v907_v39 = vpop.f32.mrf.mxu3  ;;  %1051 = vst [vmem:[%s1883_s26 + $0x100] sm:$0xff] %v987_v40  ;;  %v357_v40 = vld [vmem:[%s1883_s26 + $0x170] sm:$0xff] }
 0x1b7   : > { %v908_v41 = vadd.f32 %v907_v39, %v794_v37 }
 0x1b9   : > { %v988_v42 = vadd.f32 %v908_v41, %v344_v38  ;;  %v571_v43 = vpop.f32.mrf.mxu0  ;;  %v684_v45 = vpop.f32.mrf.mxu1 }
 0x1ba   : > { %v685_v46 = vadd.f32 %v684_v45, %v571_v43 }
 0x1bb   : > { %1052 = vst [vmem:[%s1883_s26 + $0x108] sm:$0xff] %v988_v42 }
 0x1bc   : > { %v989_v50 = vadd.f32 %v685_v46, %v345_v44  ;;  %v358_v44 = vld [vmem:[%s1883_s26 + $0x178] sm:$0xff] }
 0x1bd   : > { %v797_v47 = vpop.f32.mrf.mxu2 }
 0x1be   : > { %v910_v49 = vpop.f32.mrf.mxu3  ;;  %1053 = vst [vmem:[%s1883_s26 + $0x110] sm:$0xff] %v989_v50  ;;  %v359_v50 = vld [vmem:[%s1883_s26 + $0x180] sm:$0xff] }
 0x1bf   : > { %v911_v51 = vadd.f32 %v910_v49, %v797_v47 }
 0x1c1   : > { %v990_v52 = vadd.f32 %v911_v51, %v346_v48  ;;  %v574_v53 = vpop.f32.mrf.mxu0  ;;  %v687_v55 = vpop.f32.mrf.mxu1 }
 0x1c2   : > { %v688_v56 = vadd.f32 %v687_v55, %v574_v53 }
 0x1c3   : > { %1054 = vst [vmem:[%s1883_s26 + $0x118] sm:$0xff] %v990_v52 }
 0x1c4   : > { %v991_v60 = vadd.f32 %v688_v56, %v347_v54  ;;  %v360_v54 = vld [vmem:[%s1883_s26 + $0x188] sm:$0xff] }
 0x1c5   : > { %v800_v57 = vpop.f32.mrf.mxu2 }
 0x1c6   : > { %v913_v59 = vpop.f32.mrf.mxu3  ;;  %1055 = vst [vmem:[%s1883_s26 + $0x120] sm:$0xff] %v991_v60  ;;  %v361_v60 = vld [vmem:[%s1883_s26 + $0x190] sm:$0xff] }
 0x1c7   : > { %v914_v61 = vadd.f32 %v913_v59, %v800_v57 }
 0x1c9   : > { %v992_v62 = vadd.f32 %v914_v61, %v348_v58  ;;  %v577_v63 = vpop.f32.mrf.mxu0  ;;  %v690_v1 = vpop.f32.mrf.mxu1 }
 0x1ca   : > { %v691_v2 = vadd.f32 %v690_v1, %v577_v63 }
 0x1cb   : > { %1056 = vst [vmem:[%s1883_s26 + $0x128] sm:$0xff] %v992_v62 }
 0x1cc   : > { %v993_v6 = vadd.f32 %v691_v2, %v349_v0  ;;  %v362_v0 = vld [vmem:[%s1883_s26 + $0x198] sm:$0xff] }
 0x1cd   : > { %v803_v3 = vpop.f32.mrf.mxu2 }
 0x1ce   : > { %v916_v5 = vpop.f32.mrf.mxu3  ;;  %1057 = vst [vmem:[%s1883_s26 + $0x130] sm:$0xff] %v993_v6  ;;  %v363_v6 = vld [vmem:[%s1883_s26 + $0x1a0] sm:$0xff] }
 0x1cf   : > { %v917_v7 = vadd.f32 %v916_v5, %v803_v3 }
 0x1d1   : > { %v994_v8 = vadd.f32 %v917_v7, %v350_v4  ;;  %v580_v9 = vpop.f32.mrf.mxu0  ;;  %v693_v11 = vpop.f32.mrf.mxu1 }
 0x1d2   : > { %v694_v12 = vadd.f32 %v693_v11, %v580_v9 }
 0x1d3   : > { %1058 = vst [vmem:[%s1883_s26 + $0x138] sm:$0xff] %v994_v8 }
 0x1d4   : > { %v995_v16 = vadd.f32 %v694_v12, %v351_v10  ;;  %v364_v10 = vld [vmem:[%s1883_s26 + $0x1a8] sm:$0xff] }
 0x1d5   : > { %v806_v13 = vpop.f32.mrf.mxu2 }
 0x1d6   : > { %v919_v15 = vpop.f32.mrf.mxu3  ;;  %1059 = vst [vmem:[%s1883_s26 + $0x140] sm:$0xff] %v995_v16  ;;  %v365_v16 = vld [vmem:[%s1883_s26 + $0x1b0] sm:$0xff] }
 0x1d7   : > { %v920_v17 = vadd.f32 %v919_v15, %v806_v13 }
 0x1d9   : > { %v996_v18 = vadd.f32 %v920_v17, %v352_v14  ;;  %v583_v19 = vpop.f32.mrf.mxu0  ;;  %v696_v21 = vpop.f32.mrf.mxu1 }
 0x1da   : > { %v697_v22 = vadd.f32 %v696_v21, %v583_v19 }
 0x1db   : > { %1060 = vst [vmem:[%s1883_s26 + $0x148] sm:$0xff] %v996_v18 }
 0x1dc   : > { %v997_v26 = vadd.f32 %v697_v22, %v353_v20  ;;  %v366_v20 = vld [vmem:[%s1883_s26 + $0x1b8] sm:$0xff] }
 0x1dd   : > { %v809_v23 = vpop.f32.mrf.mxu2 }
 0x1de   : > { %v922_v25 = vpop.f32.mrf.mxu3  ;;  %1061 = vst [vmem:[%s1883_s26 + $0x150] sm:$0xff] %v997_v26  ;;  %v367_v26 = vld [vmem:[%s1883_s26 + $0x1c0] sm:$0xff] }
 0x1df   : > { %v923_v27 = vadd.f32 %v922_v25, %v809_v23 }
 0x1e1   : > { %v998_v28 = vadd.f32 %v923_v27, %v354_v24  ;;  %v586_v29 = vpop.f32.mrf.mxu0  ;;  %v699_v31 = vpop.f32.mrf.mxu1 }
 0x1e2   : > { %v700_v32 = vadd.f32 %v699_v31, %v586_v29 }
 0x1e3   : > { %1062 = vst [vmem:[%s1883_s26 + $0x158] sm:$0xff] %v998_v28 }
 0x1e4   : > { %v999_v36 = vadd.f32 %v700_v32, %v355_v30  ;;  %v368_v30 = vld [vmem:[%s1883_s26 + $0x1c8] sm:$0xff] }
 0x1e5   : > { %v812_v33 = vpop.f32.mrf.mxu2 }
 0x1e6   : > { %v925_v35 = vpop.f32.mrf.mxu3  ;;  %1063 = vst [vmem:[%s1883_s26 + $0x160] sm:$0xff] %v999_v36  ;;  %v369_v36 = vld [vmem:[%s1883_s26 + $0x1d0] sm:$0xff] }
 0x1e7   : > { %v926_v37 = vadd.f32 %v925_v35, %v812_v33 }
 0x1e9   : > { %v1000_v38 = vadd.f32 %v926_v37, %v356_v34  ;;  %v589_v39 = vpop.f32.mrf.mxu0  ;;  %v702_v41 = vpop.f32.mrf.mxu1 }
 0x1ea   : > { %v703_v42 = vadd.f32 %v702_v41, %v589_v39 }
 0x1eb   : > { %1064 = vst [vmem:[%s1883_s26 + $0x168] sm:$0xff] %v1000_v38 }
 0x1ec   : > { %v1001_v46 = vadd.f32 %v703_v42, %v357_v40  ;;  %v370_v40 = vld [vmem:[%s1883_s26 + $0x1d8] sm:$0xff] }
 0x1ed   : > { %v815_v43 = vpop.f32.mrf.mxu2 }
 0x1ee   : > { %v928_v45 = vpop.f32.mrf.mxu3  ;;  %1065 = vst [vmem:[%s1883_s26 + $0x170] sm:$0xff] %v1001_v46  ;;  %v371_v46 = vld [vmem:[%s1883_s26 + $0x1e0] sm:$0xff] }
 0x1ef   : > { %v929_v47 = vadd.f32 %v928_v45, %v815_v43 }
 0x1f1   : > { %v1002_v48 = vadd.f32 %v929_v47, %v358_v44  ;;  %v592_v49 = vpop.f32.mrf.mxu0  ;;  %v705_v51 = vpop.f32.mrf.mxu1 }
 0x1f2   : > { %v706_v52 = vadd.f32 %v705_v51, %v592_v49 }
 0x1f3   : > { %1066 = vst [vmem:[%s1883_s26 + $0x178] sm:$0xff] %v1002_v48 }
 0x1f4   : > { %v1003_v56 = vadd.f32 %v706_v52, %v359_v50  ;;  %v372_v50 = vld [vmem:[%s1883_s26 + $0x1e8] sm:$0xff] }
 0x1f5   : > { %v818_v53 = vpop.f32.mrf.mxu2 }
 0x1f6   : > { %v931_v55 = vpop.f32.mrf.mxu3  ;;  %1067 = vst [vmem:[%s1883_s26 + $0x180] sm:$0xff] %v1003_v56  ;;  %v373_v56 = vld [vmem:[%s1883_s26 + $0x1f0] sm:$0xff] }
 0x1f7   : > { %v932_v57 = vadd.f32 %v931_v55, %v818_v53 }
 0x1f9   : > { %v1004_v58 = vadd.f32 %v932_v57, %v360_v54  ;;  %v595_v59 = vpop.f32.mrf.mxu0  ;;  %v708_v61 = vpop.f32.mrf.mxu1 }
 0x1fa   : > { %v709_v62 = vadd.f32 %v708_v61, %v595_v59 }
 0x1fb   : > { %1068 = vst [vmem:[%s1883_s26 + $0x188] sm:$0xff] %v1004_v58 }
 0x1fc   : > { %v1005_v2 = vadd.f32 %v709_v62, %v361_v60  ;;  %v374_v60 = vld [vmem:[%s1883_s26 + $0x1f8] sm:$0xff] }
 0x1fd   : > { %v821_v63 = vpop.f32.mrf.mxu2 }
 0x1fe   : > { %v934_v1 = vpop.f32.mrf.mxu3  ;;  %1069 = vst [vmem:[%s1883_s26 + $0x190] sm:$0xff] %v1005_v2 }
 0x1ff   : > { %v935_v3 = vadd.f32 %v934_v1, %v821_v63 }
 0x201   : > { %v1006_v4 = vadd.f32 %v935_v3, %v362_v0  ;;  %v598_v5 = vpop.f32.mrf.mxu0  ;;  %v711_v7 = vpop.f32.mrf.mxu1 }
 0x202   : > { %v712_v8 = vadd.f32 %v711_v7, %v598_v5 }
 0x203   : > { %1070 = vst [vmem:[%s1883_s26 + $0x198] sm:$0xff] %v1006_v4 }
 0x204   : > { %v1007_v12 = vadd.f32 %v712_v8, %v363_v6 }
 0x205   : > { %v824_v9 = vpop.f32.mrf.mxu2 }
 0x206   : > { %v937_v11 = vpop.f32.mrf.mxu3  ;;  %1071 = vst [vmem:[%s1883_s26 + $0x1a0] sm:$0xff] %v1007_v12 }
 0x207   : > { %v938_v13 = vadd.f32 %v937_v11, %v824_v9 }
 0x209   : > { %v1008_v14 = vadd.f32 %v938_v13, %v364_v10  ;;  %v601_v15 = vpop.f32.mrf.mxu0  ;;  %v714_v17 = vpop.f32.mrf.mxu1 }
 0x20a   : > { %v715_v18 = vadd.f32 %v714_v17, %v601_v15 }
 0x20b   : > { %1072 = vst [vmem:[%s1883_s26 + $0x1a8] sm:$0xff] %v1008_v14 }
 0x20c   : > { %v1009_v22 = vadd.f32 %v715_v18, %v365_v16 }
 0x20d   : > { %v827_v19 = vpop.f32.mrf.mxu2 }
 0x20e   : > { %v940_v21 = vpop.f32.mrf.mxu3  ;;  %1073 = vst [vmem:[%s1883_s26 + $0x1b0] sm:$0xff] %v1009_v22 }
 0x20f   : > { %v941_v23 = vadd.f32 %v940_v21, %v827_v19 }
 0x211   : > { %v1010_v24 = vadd.f32 %v941_v23, %v366_v20  ;;  %v604_v25 = vpop.f32.mrf.mxu0  ;;  %v717_v27 = vpop.f32.mrf.mxu1 }
 0x212   : > { %v718_v28 = vadd.f32 %v717_v27, %v604_v25 }
 0x213   : > { %1074 = vst [vmem:[%s1883_s26 + $0x1b8] sm:$0xff] %v1010_v24 }
 0x214   : > { %v1011_v32 = vadd.f32 %v718_v28, %v367_v26 }
 0x215   : > { %v830_v29 = vpop.f32.mrf.mxu2 }
 0x216   : > { %v943_v31 = vpop.f32.mrf.mxu3  ;;  %1075 = vst [vmem:[%s1883_s26 + $0x1c0] sm:$0xff] %v1011_v32 }
 0x217   : > { %v944_v33 = vadd.f32 %v943_v31, %v830_v29 }
 0x219   : > { %v1012_v34 = vadd.f32 %v944_v33, %v368_v30  ;;  %v607_v35 = vpop.f32.mrf.mxu0  ;;  %v720_v37 = vpop.f32.mrf.mxu1 }
 0x21a   : > { %v721_v38 = vadd.f32 %v720_v37, %v607_v35 }
 0x21b   : > { %1076 = vst [vmem:[%s1883_s26 + $0x1c8] sm:$0xff] %v1012_v34 }
 0x21c   : > { %v1013_v42 = vadd.f32 %v721_v38, %v369_v36 }
 0x21d   : > { %v833_v39 = vpop.f32.mrf.mxu2 }
 0x21e   : > { %v946_v41 = vpop.f32.mrf.mxu3  ;;  %1077 = vst [vmem:[%s1883_s26 + $0x1d0] sm:$0xff] %v1013_v42 }
 0x21f   : > { %v947_v43 = vadd.f32 %v946_v41, %v833_v39 }
 0x221   : > { %v1014_v44 = vadd.f32 %v947_v43, %v370_v40  ;;  %v610_v45 = vpop.f32.mrf.mxu0  ;;  %v723_v47 = vpop.f32.mrf.mxu1 }
 0x222   : > { %v724_v48 = vadd.f32 %v723_v47, %v610_v45 }
 0x223   : > { %1078 = vst [vmem:[%s1883_s26 + $0x1d8] sm:$0xff] %v1014_v44 }
 0x224   : > { %v1015_v52 = vadd.f32 %v724_v48, %v371_v46 }
 0x225   : > { %v836_v49 = vpop.f32.mrf.mxu2 }
 0x226   : > { %v949_v51 = vpop.f32.mrf.mxu3  ;;  %1079 = vst [vmem:[%s1883_s26 + $0x1e0] sm:$0xff] %v1015_v52 }
 0x227   : > { %v950_v53 = vadd.f32 %v949_v51, %v836_v49 }
 0x229   : > { %v1016_v54 = vadd.f32 %v950_v53, %v372_v50  ;;  %v613_v55 = vpop.f32.mrf.mxu0  ;;  %v726_v57 = vpop.f32.mrf.mxu1 }
 0x22a   : > { %v727_v58 = vadd.f32 %v726_v57, %v613_v55 }
 0x22b   : > { %1080 = vst [vmem:[%s1883_s26 + $0x1e8] sm:$0xff] %v1016_v54 }
 0x22c   : > { %v1017_v62 = vadd.f32 %v727_v58, %v373_v56 }
 0x22d   : > { %v839_v59 = vpop.f32.mrf.mxu2 }
 0x22e   : > { %v952_v61 = vpop.f32.mrf.mxu3  ;;  %1081 = vst [vmem:[%s1883_s26 + $0x1f0] sm:$0xff] %v1017_v62 }
 0x22f   : > { %v953_v63 = vadd.f32 %v952_v61, %v839_v59 }
 0x231   : > { %v1018_v0 = vadd.f32 %v953_v63, %v374_v60 }
 0x233   : > { %1082 = vst [vmem:[%s1883_s26 + $0x1f8] sm:$0xff] %v1018_v0 }
 0x234   : > { %1494 = shalt.err (!%p1491_p13)
}
 0x235   : > { %s1639_s17 = smov 256   ;;  %s1640_s26 = smov 512  }
 0x236   : > { %s1641_s27 = smov 16  }
 0x237   : > { %1257 = dma.vmem_to_hbm [thread:$0]  (%p1829_p4), %s1100_s3, 8192, %s1102_s6, %s1084_s28, %s1639_s17, %s1640_s26, %s1641_s27  }
 0x238 PF: > { %p1271_p1 = scmp.ge.s32.totalorder %s1633_s24, 2  ;;  %s1116_s30 = sand.u32 1, %s1573_s9  }
 0x239   : > { %s1117_s2 = scalar_lea.sflag [#allocation4], %s1116_s30 }
 0x23a   : > { %p1267_p10 = pnand %p1271_p1, %p1844_p5 }
 0x23c   : > { %p1268_p8 = pneg %p1267_p10 }
 0x23e   : > { %1568 = dma.done.wait (%p1268_p8), %s1117_s2, 8192  }
 0x23f   : > { %1570 = vsyncadd (%p1268_p8), %s1117_s2, 4294959104  ;;  %s21_s24 = sadd.s32 1, %s1633_s24   ;;  %s2394_s7 = sld [smem:[#allocation21_spill]] }
 0x240   : > { %p2293_p9 = scmp.ge.s32.totalorder %s21_s24, 10   ;;  %s2395_s5 = sld [smem:[#allocation11_spill]] }
 0x241   : > { %s2396_s14 = sld [smem:[#allocation19_spill]]  ;;  %s2403_s9 = smov %s1577_s10 }
 0x242   : > { %s2397_s3 = sld [smem:[#allocation12_spill]]  ;;  %s2404_s10 = smov %s1581_s11 }
 0x243   : > { %s2398_s17 = sld [smem:[#allocation20_spill]]  ;;  %s2406_s12 = smov %s1589_s13 }
 0x244   : > { %s2399_s20 = sld [smem:[#allocation15_spill]]  ;;  %s2408_s15 = smov %s1601_s16 }
 0x245   : > { %s2400_s6 = sld [smem:[#allocation16_spill]]  ;;  %s2405_s11 = smov %s2394_s7 }
 0x246   : > { %s2401_s28 = sld [smem:[#allocation17_spill]]  ;;  %s2407_s13 = smov %s2395_s5 }
 0x247   : > { %s2402_s23 = sld [smem:[#allocation18_spill]]  ;;  %s2410_s18 = smov %s1621_s21 }
 0x248   : > { %s2409_s16 = smov %s2397_s3  ;;  %s2411_s19 = smov %s1625_s22 }
 0x249   :  { %20 = sbr.rel (!%p2293_p9) target bundleno = 16 (0x10), region = 90 }
 0x24b   : > { %s2412_s21 = smov %s2400_s6 }
 0x24c   : > { %s2413_s22 = smov %s2401_s28 }
 0x24e   :  { %1123 = vsyncpa [#allocation3], 1 }
 0x24f   :  { %1125 = vsyncpa [#allocation3 + $0x1], 1 }
 0x250   :  { %1126 = vsyncpa [#allocation6], 1 }
 0x251   :  { %1128 = vsyncpa [#allocation6 + $0x1], 1 }
 0x252   :  { %1129 = vsyncpa [#allocation4], 1 }
 0x253   :  { %1131 = vsyncpa [#allocation4 + $0x1], 1 }

</bundles_post_ra>
